<compile_context>
chip_gen: v7x
topology: tpu7x:2x2x1
jax: 0.10.0
libtpu: 0.0.40
codegen_flags: <defaults>
</compile_context>

<pallas_src>
import functools

import jax
import jax.numpy as jnp
from jax.experimental import pallas as pl
from jax.experimental.pallas import tpu as pltpu

LEAKY_SLOPE = 0.01   # PyTorch nn.LeakyReLU default


def _leaky(x):
    return jnp.where(x >= 0, x, LEAKY_SLOPE * x)


# --------------------------------------------------------------------------- #
# Pallas kernel: full TSception forward for one tile of B_TILE samples.
# --------------------------------------------------------------------------- #
def _tsception_kernel(x_ref, mall_ref, pmat_ref, lmat_ref, cvec_ref,
                      w1e_ref, b1e_ref, w2_ref, b2_ref, o_ref,
                      *, num_T, num_H, b_tile):
    x = x_ref[...]                                       # (b_tile*C, T+1) bf16

    # ---- Tception (3 bands fused per filter) -> pool -> Sception conv (per-f
    #      block-diagonal matmul with BN_t scale folded in), accumulated over f.
    z = None
    for f in range(num_T):
        conv = jnp.dot(x, mall_ref[f], preferred_element_type=jnp.float32)
        act = _leaky(conv).astype(jnp.bfloat16)          # conv+bias -> LeakyReLU
        pooled = jnp.dot(act, pmat_ref[...],             # AvgPool(1,8) as matmul
                         preferred_element_type=jnp.float32)
        contrib = jnp.dot(lmat_ref[f], pooled.astype(jnp.bfloat16),
                          preferred_element_type=jnp.float32)
        z = contrib if z is None else z + contrib

    # ---- Sception bias + folded BN_t shift, then LeakyReLU.  Rows are (h, b).
    z = _leaky(z + cvec_ref[...]).astype(jnp.bfloat16)   # (num_H*b_tile, Wtot)

    # ---- AvgPool(1,2) + BN_s + flatten + fc1 folded into w1e; accumulate per h.
    hid = None
    for h in range(num_H):
        part = jnp.dot(z[h * b_tile:(h + 1) * b_tile, :], w1e_ref[h],
                       preferred_element_type=jnp.float32)
        hid = part if hid is None else hid + part
    hid = jnp.maximum(hid + b1e_ref[...], 0.0)           # (b_tile, hidden)
    # TODO(synk): nn.Dropout is the inference identity here (no RNG masking).

    out = jnp.dot(hid.astype(jnp.bfloat16), w2_ref[...],
                  preferred_element_type=jnp.float32) + b2_ref[...]
    o_ref[...] = out.astype(jnp.float32)                 # (b_tile, num_classes)


# --------------------------------------------------------------------------- #
# Glue: conv-as-matmul band matrices, pooling matrices, parameter folding.
# --------------------------------------------------------------------------- #
def _band_matrix(w, T):
    """w: (F, k) temporal filters -> (F, T, T-k+1) so x(R,T) @ M[f] == valid conv."""
    F, k = w.shape
    Wc = T - k + 1
    t = jnp.arange(T)[:, None]
    u = jnp.arange(Wc)[None, :]
    d = t - u
    valid = (d >= 0) & (d < k)
    idx = jnp.clip(d, 0, k - 1)
    return jnp.where(valid[None, :, :], w[:, idx], 0.0).astype(jnp.float32)


def _pool_block(width, pool):
    """(width, width//pool) averaging matrix, kernel=stride=pool, floor trunc."""
    Wp = width // pool
    u = jnp.arange(width)[:, None]
    o = jnp.arange(Wp)[None, :]
    sel = (u >= o * pool) & (u < (o + 1) * pool)
    return jnp.where(sel, 1.0 / pool, 0.0).astype(jnp.float32)


def init_tsception_params(key, *, num_classes, input_size, sampling_rate,
                          num_T, num_S, hidden):
    C, T = int(input_size[-2]), int(input_size[-1])
    ks = [int(0.5 * sampling_rate), int(0.25 * sampling_rate), int(0.125 * sampling_rate)]
    keys = jax.random.split(key, 12)
    p = {}
    for i, k in enumerate(ks):
        p[f"wt{i + 1}"] = 0.1 * jax.random.normal(keys[i], (num_T, k), jnp.float32)
        p[f"bt{i + 1}"] = 0.05 * jax.random.normal(keys[3 + i], (num_T,), jnp.float32)
    p["ws1"] = 0.1 * jax.random.normal(keys[6], (num_S, num_T, C), jnp.float32)
    p["bs1"] = 0.05 * jax.random.normal(keys[7], (num_S,), jnp.float32)
    p["ws2"] = 0.1 * jax.random.normal(keys[8], (num_S, num_T, C // 2), jnp.float32)
    p["bs2"] = 0.05 * jax.random.normal(keys[9], (num_S,), jnp.float32)
    # BatchNorm (PyTorch defaults: gamma=1, beta=0, running mean=0, var=1)
    p["bn_t_gamma"] = jnp.ones((num_T,), jnp.float32)
    p["bn_t_beta"] = jnp.zeros((num_T,), jnp.float32)
    p["bn_t_mean"] = jnp.zeros((num_T,), jnp.float32)
    p["bn_t_var"] = jnp.ones((num_T,), jnp.float32)
    p["bn_s_gamma"] = jnp.ones((num_S,), jnp.float32)
    p["bn_s_beta"] = jnp.zeros((num_S,), jnp.float32)
    p["bn_s_mean"] = jnp.zeros((num_S,), jnp.float32)
    p["bn_s_var"] = jnp.ones((num_S,), jnp.float32)
    # flattened feature size (analytic equivalent of get_size())
    pool_t, pool_s = 8, 2
    Wtot = sum((T - k + 1) // pool_t for k in ks)
    Ws = Wtot // pool_s
    D = num_S * 3 * Ws
    p["fc1_w"] = 0.1 * jax.random.normal(keys[10], (D, hidden), jnp.float32)
    p["fc1_b"] = jnp.zeros((hidden,), jnp.float32)
    p["fc2_w"] = 0.1 * jax.random.normal(keys[11], (hidden, num_classes), jnp.float32)
    p["fc2_b"] = jnp.zeros((num_classes,), jnp.float32)
    return p


def tsception_forward(x_nchw, params, *, b_tile=16):
    B, one, C, T = x_nchw.shape
    assert one == 1 and C % 2 == 0
    assert (b_tile * C) % 8 == 0
    eps = 1e-5
    pool_t, pool_s = 8, 2
    num_T = params["wt1"].shape[0]
    num_S = params["ws1"].shape[0]
    num_H = 3 * num_S                                    # heights: Scep1, Scep2-top, Scep2-bot
    hidden = params["fc1_w"].shape[1]
    num_classes = params["fc2_w"].shape[1]

    # ---- Tception: fused band matrices (+ bias row for the ones-column), pool matrix
    Ms, Wcs, Wps, brows = [], [], [], []
    for i in (1, 2, 3):
        M = _band_matrix(params[f"wt{i}"], T)            # (num_T, T, Wc_i)
        Wc = M.shape[2]
        Ms.append(M)
        Wcs.append(Wc)
        Wps.append(Wc // pool_t)
        brows.append(jnp.broadcast_to(params[f"bt{i}"][:, None, None], (num_T, 1, Wc)))
    Wcsum, Wtot = sum(Wcs), sum(Wps)
    Ws = Wtot // pool_s
    mall = jnp.concatenate([jnp.concatenate(Ms, axis=2),
                            jnp.concatenate(brows, axis=2)], axis=1)   # (num_T, T+1, Wcsum)

    pmat = jnp.zeros((Wcsum, Wtot), jnp.float32)
    ro = co = 0
    for Wc, Wp in zip(Wcs, Wps):
        pmat = pmat.at[ro:ro + Wc, co:co + Wp].set(_pool_block(Wc, pool_t))
        ro += Wc
        co += Wp

    # ---- Sception conv weights in "height" layout h = s*3 + {Scep1, Scep2 top, Scep2 bot}
    Ch = C // 2
    wsc = jnp.zeros((num_H, num_T, C), jnp.float32)
    bsc = jnp.zeros((num_H,), jnp.float32)
    for s in range(num_S):
        wsc = wsc.at[3 * s + 0].set(params["ws1"][s])
        wsc = wsc.at[3 * s + 1, :, :Ch].set(params["ws2"][s])
        wsc = wsc.at[3 * s + 2, :, Ch:2 * Ch].set(params["ws2"][s])
        bsc = bsc.at[3 * s + 0].set(params["bs1"][s])
        bsc = bsc.at[3 * s + 1].set(params["bs2"][s])
        bsc = bsc.at[3 * s + 2].set(params["bs2"][s])

    # ---- Fold inference BN_t into the Sception matmul (scale) and bias column (shift)
    sc_t = params["bn_t_gamma"] / jnp.sqrt(params["bn_t_var"] + eps)
    sh_t = params["bn_t_beta"] - params["bn_t_mean"] * sc_t
    wsc_scaled = wsc * sc_t[None, :, None]                               # (H, num_T, C)
    cvec_h = bsc + jnp.einsum("hfc,f->h", wsc, sh_t)                     # (H,)
    cvec = jnp.repeat(cvec_h, b_tile)[:, None]                           # rows (h, b)

    # L[f]: Sception conv for the whole batch tile, block-diagonal over samples.
    # rows (h, b), cols (b', c);  L[f,(h,b),(b',c)] = [b==b'] * sc_t[f] * wsc[h,f,c]
    eye = jnp.eye(b_tile, dtype=jnp.float32)
    lmat = jnp.einsum("hfc,bd->fhbdc", wsc_scaled, eye).reshape(
        num_T, num_H * b_tile, b_tile * C)

    # ---- Fold AvgPool(1,2) + inference BN_s + flatten into fc1
    sc_s = params["bn_s_gamma"] / jnp.sqrt(params["bn_s_var"] + eps)
    sh_s = params["bn_s_beta"] - params["bn_s_mean"] * sc_s
    sc_h = sc_s[jnp.arange(num_H) // 3]
    sh_h = sh_s[jnp.arange(num_H) // 3]
    w1 = params["fc1_w"]                                                 # (H*Ws, hidden)
    assert w1.shape[0] == num_H * Ws
    w1r = w1.reshape(num_H, Ws, hidden)
    w1e = 0.5 * jnp.repeat(w1r, pool_s, axis=1) * sc_h[:, None, None]    # (H, 2*Ws, hidden)
    if Wtot > pool_s * Ws:   # pooling floor-truncation: dropped columns get zero weight
        w1e = jnp.concatenate(
            [w1e, jnp.zeros((num_H, Wtot - pool_s * Ws, hidden), jnp.float32)], axis=1)
    b1e = (params["fc1_b"] + jnp.einsum("h,hn->n", sh_h, w1r.sum(axis=1)))[None, :]

    w2 = params["fc2_w"]
    b2 = params["fc2_b"][None, :]

    # ---- Batch tiling: rows (b, c); conv bias rides on an appended ones column
    B_pad = -(-B // b_tile) * b_tile
    x = x_nchw[:, 0].astype(jnp.float32)
    if B_pad > B:
        x = jnp.concatenate([x, jnp.zeros((B_pad - B, C, T), jnp.float32)], axis=0)
    x_aug = jnp.concatenate([x, jnp.ones((B_pad, C, 1), jnp.float32)], axis=-1)
    x_slab = x_aug.reshape(B_pad * C, T + 1).astype(jnp.bfloat16)

    # bf16 matmul operands; elementwise / accumulation stays f32 in the kernel
    mall = mall.astype(jnp.bfloat16)
    pmat = pmat.astype(jnp.bfloat16)
    lmat = lmat.astype(jnp.bfloat16)
    w1e = w1e.astype(jnp.bfloat16)
    w2 = w2.astype(jnp.bfloat16)

    consts = [mall, pmat, lmat, cvec, w1e, b1e, w2, b2]

    def const_spec(a):
        nd = a.ndim
        # TODO(synk): single-buffer constants (pipeline_mode=pl.Buffered(1)) once
        # universally supported; their block index never changes across the grid.
        return pl.BlockSpec(a.shape, lambda i, nd=nd: (0,) * nd)

    kernel = functools.partial(_tsception_kernel,
                               num_T=num_T, num_H=num_H, b_tile=b_tile)

    out = pl.pallas_call(
        kernel,
        out_shape=jax.ShapeDtypeStruct((B_pad, num_classes), jnp.float32),
        grid=(B_pad // b_tile,),
        in_specs=[pl.BlockSpec((b_tile * C, T + 1), lambda i: (i, 0))]
                 + [const_spec(a) for a in consts],
        out_specs=pl.BlockSpec((b_tile, num_classes), lambda i: (i, 0)),
        compiler_params=pltpu.CompilerParams(dimension_semantics=("parallel",)),
    )(x_slab, *consts)
    return out[:B]


if __name__ == "__main__":
    key = jax.random.PRNGKey(0)
    num_classes, hidden = 2, 32
    C, T = 4, 64                 # eeg channels, time samples
    sampling_rate = 16           # -> temporal kernels (1,8), (1,4), (1,2)
    num_T, num_S = 4, 4
    B = 32
    input_size = (1, C, T)

    kp, kx = jax.random.split(key)
    params = init_tsception_params(kp, num_classes=num_classes, input_size=input_size,
                                   sampling_rate=sampling_rate, num_T=num_T,
                                   num_S=num_S, hidden=hidden)
    x = jax.random.normal(kx, (B, 1, C, T), jnp.float32)   # NCHW like PyTorch

    y = tsception_forward(x, params, b_tile=16)
    jax.block_until_ready(y)
    assert y.shape == (B, num_classes)
    assert bool(jnp.all(jnp.isfinite(y)))
    print("KERNEL_OK")
</pallas_src>

<mosaic_0001>
module attributes {stable_mosaic.version = 11 : i64} {
  func.func @_tsception_kernel(%arg0: i32, %arg1: memref<64x65xbf16, #tpu.memory_space<vmem>>, %arg2: memref<4x65x181xbf16, #tpu.memory_space<vmem>>, %arg3: memref<181x21xbf16, #tpu.memory_space<vmem>>, %arg4: memref<4x192x64xbf16, #tpu.memory_space<vmem>>, %arg5: memref<192x1xf32, #tpu.memory_space<vmem>>, %arg6: memref<12x21x32xbf16, #tpu.memory_space<vmem>>, %arg7: memref<1x32xf32, #tpu.memory_space<vmem>>, %arg8: memref<32x2xbf16, #tpu.memory_space<vmem>>, %arg9: memref<1x2xf32, #tpu.memory_space<vmem>>, %arg10: memref<16x2xf32, #tpu.memory_space<vmem>>) attributes {dimension_semantics = [#tpu.dimension_semantics<parallel>], iteration_bounds = array<i64: 2>, scalar_prefetch = 0 : i64, scratch_operands = 0 : i64, tpu.core_type = #tpu.core_type<tc>, window_params = [{transform_indices = @transform_0, window_bounds = array<i64: 64, 65>}, {pipeline_mode = #tpu.pipeline_mode<synchronous>, transform_indices = @transform_1, window_bounds = array<i64: 4, 65, 181>}, {pipeline_mode = #tpu.pipeline_mode<synchronous>, transform_indices = @transform_2, window_bounds = array<i64: 181, 21>}, {pipeline_mode = #tpu.pipeline_mode<synchronous>, transform_indices = @transform_3, window_bounds = array<i64: 4, 192, 64>}, {pipeline_mode = #tpu.pipeline_mode<synchronous>, transform_indices = @transform_4, window_bounds = array<i64: 192, 1>}, {pipeline_mode = #tpu.pipeline_mode<synchronous>, transform_indices = @transform_5, window_bounds = array<i64: 12, 21, 32>}, {pipeline_mode = #tpu.pipeline_mode<synchronous>, transform_indices = @transform_6, window_bounds = array<i64: 1, 32>}, {pipeline_mode = #tpu.pipeline_mode<synchronous>, transform_indices = @transform_7, window_bounds = array<i64: 32, 2>}, {pipeline_mode = #tpu.pipeline_mode<synchronous>, transform_indices = @transform_8, window_bounds = array<i64: 1, 2>}, {transform_indices = @transform_9, window_bounds = array<i64: 16, 2>}]} {
    %c0 = arith.constant 0 : index
    %c0_0 = arith.constant 0 : index
    %0 = vector.load %arg1[%c0, %c0_0] : memref<64x65xbf16, #tpu.memory_space<vmem>>, vector<64x65xbf16>
    %c0_1 = arith.constant 0 : index
    %c0_2 = arith.constant 0 : index
    %c0_3 = arith.constant 0 : index
    %1 = vector.load %arg2[%c0_1, %c0_2, %c0_3] : memref<4x65x181xbf16, #tpu.memory_space<vmem>>, vector<1x65x181xbf16>
    %2 = vector.shape_cast %1 : vector<1x65x181xbf16> to vector<65x181xbf16>
    %cst = arith.constant dense<0.000000e+00> : vector<64x181xf32>
    %3 = tpu.matmul %0, %2, %cst {dimension_numbers = #tpu.dot_dimension_numbers<[1], [0], [0], [1], [0, 0, 1, 1], [], []>} : vector<64x65xbf16>, vector<65x181xbf16>, vector<64x181xf32> -> vector<64x181xf32>
    %cst_4 = arith.constant 0.000000e+00 : f32
    %4 = vector.broadcast %cst_4 : f32 to vector<64x181xf32>
    %5 = arith.cmpf oge, %3, %4 : vector<64x181xf32>
    %cst_5 = arith.constant 0.00999999977 : f32
    %6 = vector.broadcast %cst_5 : f32 to vector<64x181xf32>
    %7 = arith.mulf %6, %3 : vector<64x181xf32>
    %8 = arith.select %5, %3, %7 : vector<64x181xi1>, vector<64x181xf32>
    %9 = arith.truncf %8 : vector<64x181xf32> to vector<64x181xbf16>
    %c0_6 = arith.constant 0 : index
    %c0_7 = arith.constant 0 : index
    %10 = vector.load %arg3[%c0_6, %c0_7] : memref<181x21xbf16, #tpu.memory_space<vmem>>, vector<181x21xbf16>
    %cst_8 = arith.constant dense<0.000000e+00> : vector<64x21xf32>
    %11 = tpu.matmul %9, %10, %cst_8 {dimension_numbers = #tpu.dot_dimension_numbers<[1], [0], [0], [1], [0, 0, 1, 1], [], []>} : vector<64x181xbf16>, vector<181x21xbf16>, vector<64x21xf32> -> vector<64x21xf32>
    %c0_9 = arith.constant 0 : index
    %c0_10 = arith.constant 0 : index
    %c0_11 = arith.constant 0 : index
    %12 = vector.load %arg4[%c0_9, %c0_10, %c0_11] : memref<4x192x64xbf16, #tpu.memory_space<vmem>>, vector<1x192x64xbf16>
    %13 = vector.shape_cast %12 : vector<1x192x64xbf16> to vector<192x64xbf16>
    %14 = arith.truncf %11 : vector<64x21xf32> to vector<64x21xbf16>
    %cst_12 = arith.constant dense<0.000000e+00> : vector<192x21xf32>
    %15 = tpu.matmul %13, %14, %cst_12 {dimension_numbers = #tpu.dot_dimension_numbers<[1], [0], [0], [1], [0, 0, 1, 1], [], []>} : vector<192x64xbf16>, vector<64x21xbf16>, vector<192x21xf32> -> vector<192x21xf32>
    %c1 = arith.constant 1 : index
    %c0_13 = arith.constant 0 : index
    %c0_14 = arith.constant 0 : index
    %16 = vector.load %arg2[%c1, %c0_13, %c0_14] : memref<4x65x181xbf16, #tpu.memory_space<vmem>>, vector<1x65x181xbf16>
    %17 = vector.shape_cast %16 : vector<1x65x181xbf16> to vector<65x181xbf16>
    %cst_15 = arith.constant dense<0.000000e+00> : vector<64x181xf32>
    %18 = tpu.matmul %0, %17, %cst_15 {dimension_numbers = #tpu.dot_dimension_numbers<[1], [0], [0], [1], [0, 0, 1, 1], [], []>} : vector<64x65xbf16>, vector<65x181xbf16>, vector<64x181xf32> -> vector<64x181xf32>
    %cst_16 = arith.constant 0.000000e+00 : f32
    %19 = vector.broadcast %cst_16 : f32 to vector<64x181xf32>
    %20 = arith.cmpf oge, %18, %19 : vector<64x181xf32>
    %cst_17 = arith.constant 0.00999999977 : f32
    %21 = vector.broadcast %cst_17 : f32 to vector<64x181xf32>
    %22 = arith.mulf %21, %18 : vector<64x181xf32>
    %23 = arith.select %20, %18, %22 : vector<64x181xi1>, vector<64x181xf32>
    %24 = arith.truncf %23 : vector<64x181xf32> to vector<64x181xbf16>
    %c0_18 = arith.constant 0 : index
    %c0_19 = arith.constant 0 : index
    %25 = vector.load %arg3[%c0_18, %c0_19] : memref<181x21xbf16, #tpu.memory_space<vmem>>, vector<181x21xbf16>
    %cst_20 = arith.constant dense<0.000000e+00> : vector<64x21xf32>
    %26 = tpu.matmul %24, %25, %cst_20 {dimension_numbers = #tpu.dot_dimension_numbers<[1], [0], [0], [1], [0, 0, 1, 1], [], []>} : vector<64x181xbf16>, vector<181x21xbf16>, vector<64x21xf32> -> vector<64x21xf32>
    %c1_21 = arith.constant 1 : index
    %c0_22 = arith.constant 0 : index
    %c0_23 = arith.constant 0 : index
    %27 = vector.load %arg4[%c1_21, %c0_22, %c0_23] : memref<4x192x64xbf16, #tpu.memory_space<vmem>>, vector<1x192x64xbf16>
    %28 = vector.shape_cast %27 : vector<1x192x64xbf16> to vector<192x64xbf16>
    %29 = arith.truncf %26 : vector<64x21xf32> to vector<64x21xbf16>
    %cst_24 = arith.constant dense<0.000000e+00> : vector<192x21xf32>
    %30 = tpu.matmul %28, %29, %cst_24 {dimension_numbers = #tpu.dot_dimension_numbers<[1], [0], [0], [1], [0, 0, 1, 1], [], []>} : vector<192x64xbf16>, vector<64x21xbf16>, vector<192x21xf32> -> vector<192x21xf32>
    %31 = arith.addf %15, %30 : vector<192x21xf32>
    %c2 = arith.constant 2 : index
    %c0_25 = arith.constant 0 : index
    %c0_26 = arith.constant 0 : index
    %32 = vector.load %arg2[%c2, %c0_25, %c0_26] : memref<4x65x181xbf16, #tpu.memory_space<vmem>>, vector<1x65x181xbf16>
    %33 = vector.shape_cast %32 : vector<1x65x181xbf16> to vector<65x181xbf16>
    %cst_27 = arith.constant dense<0.000000e+00> : vector<64x181xf32>
    %34 = tpu.matmul %0, %33, %cst_27 {dimension_numbers = #tpu.dot_dimension_numbers<[1], [0], [0], [1], [0, 0, 1, 1], [], []>} : vector<64x65xbf16>, vector<65x181xbf16>, vector<64x181xf32> -> vector<64x181xf32>
    %cst_28 = arith.constant 0.000000e+00 : f32
    %35 = vector.broadcast %cst_28 : f32 to vector<64x181xf32>
    %36 = arith.cmpf oge, %34, %35 : vector<64x181xf32>
    %cst_29 = arith.constant 0.00999999977 : f32
    %37 = vector.broadcast %cst_29 : f32 to vector<64x181xf32>
    %38 = arith.mulf %37, %34 : vector<64x181xf32>
    %39 = arith.select %36, %34, %38 : vector<64x181xi1>, vector<64x181xf32>
    %40 = arith.truncf %39 : vector<64x181xf32> to vector<64x181xbf16>
    %c0_30 = arith.constant 0 : index
    %c0_31 = arith.constant 0 : index
    %41 = vector.load %arg3[%c0_30, %c0_31] : memref<181x21xbf16, #tpu.memory_space<vmem>>, vector<181x21xbf16>
    %cst_32 = arith.constant dense<0.000000e+00> : vector<64x21xf32>
    %42 = tpu.matmul %40, %41, %cst_32 {dimension_numbers = #tpu.dot_dimension_numbers<[1], [0], [0], [1], [0, 0, 1, 1], [], []>} : vector<64x181xbf16>, vector<181x21xbf16>, vector<64x21xf32> -> vector<64x21xf32>
    %c2_33 = arith.constant 2 : index
    %c0_34 = arith.constant 0 : index
    %c0_35 = arith.constant 0 : index
    %43 = vector.load %arg4[%c2_33, %c0_34, %c0_35] : memref<4x192x64xbf16, #tpu.memory_space<vmem>>, vector<1x192x64xbf16>
    %44 = vector.shape_cast %43 : vector<1x192x64xbf16> to vector<192x64xbf16>
    %45 = arith.truncf %42 : vector<64x21xf32> to vector<64x21xbf16>
    %cst_36 = arith.constant dense<0.000000e+00> : vector<192x21xf32>
    %46 = tpu.matmul %44, %45, %cst_36 {dimension_numbers = #tpu.dot_dimension_numbers<[1], [0], [0], [1], [0, 0, 1, 1], [], []>} : vector<192x64xbf16>, vector<64x21xbf16>, vector<192x21xf32> -> vector<192x21xf32>
    %47 = arith.addf %31, %46 : vector<192x21xf32>
    %c3 = arith.constant 3 : index
    %c0_37 = arith.constant 0 : index
    %c0_38 = arith.constant 0 : index
    %48 = vector.load %arg2[%c3, %c0_37, %c0_38] : memref<4x65x181xbf16, #tpu.memory_space<vmem>>, vector<1x65x181xbf16>
    %49 = vector.shape_cast %48 : vector<1x65x181xbf16> to vector<65x181xbf16>
    %cst_39 = arith.constant dense<0.000000e+00> : vector<64x181xf32>
    %50 = tpu.matmul %0, %49, %cst_39 {dimension_numbers = #tpu.dot_dimension_numbers<[1], [0], [0], [1], [0, 0, 1, 1], [], []>} : vector<64x65xbf16>, vector<65x181xbf16>, vector<64x181xf32> -> vector<64x181xf32>
    %cst_40 = arith.constant 0.000000e+00 : f32
    %51 = vector.broadcast %cst_40 : f32 to vector<64x181xf32>
    %52 = arith.cmpf oge, %50, %51 : vector<64x181xf32>
    %cst_41 = arith.constant 0.00999999977 : f32
    %53 = vector.broadcast %cst_41 : f32 to vector<64x181xf32>
    %54 = arith.mulf %53, %50 : vector<64x181xf32>
    %55 = arith.select %52, %50, %54 : vector<64x181xi1>, vector<64x181xf32>
    %56 = arith.truncf %55 : vector<64x181xf32> to vector<64x181xbf16>
    %c0_42 = arith.constant 0 : index
    %c0_43 = arith.constant 0 : index
    %57 = vector.load %arg3[%c0_42, %c0_43] : memref<181x21xbf16, #tpu.memory_space<vmem>>, vector<181x21xbf16>
    %cst_44 = arith.constant dense<0.000000e+00> : vector<64x21xf32>
    %58 = tpu.matmul %56, %57, %cst_44 {dimension_numbers = #tpu.dot_dimension_numbers<[1], [0], [0], [1], [0, 0, 1, 1], [], []>} : vector<64x181xbf16>, vector<181x21xbf16>, vector<64x21xf32> -> vector<64x21xf32>
    %c3_45 = arith.constant 3 : index
    %c0_46 = arith.constant 0 : index
    %c0_47 = arith.constant 0 : index
    %59 = vector.load %arg4[%c3_45, %c0_46, %c0_47] : memref<4x192x64xbf16, #tpu.memory_space<vmem>>, vector<1x192x64xbf16>
    %60 = vector.shape_cast %59 : vector<1x192x64xbf16> to vector<192x64xbf16>
    %61 = arith.truncf %58 : vector<64x21xf32> to vector<64x21xbf16>
    %cst_48 = arith.constant dense<0.000000e+00> : vector<192x21xf32>
    %62 = tpu.matmul %60, %61, %cst_48 {dimension_numbers = #tpu.dot_dimension_numbers<[1], [0], [0], [1], [0, 0, 1, 1], [], []>} : vector<192x64xbf16>, vector<64x21xbf16>, vector<192x21xf32> -> vector<192x21xf32>
    %63 = arith.addf %47, %62 : vector<192x21xf32>
    %c0_49 = arith.constant 0 : index
    %c0_50 = arith.constant 0 : index
    %64 = vector.load %arg5[%c0_49, %c0_50] : memref<192x1xf32, #tpu.memory_space<vmem>>, vector<192x1xf32>
    %65 = vector.broadcast %64 : vector<192x1xf32> to vector<192x21xf32>
    %66 = arith.addf %63, %65 : vector<192x21xf32>
    %cst_51 = arith.constant 0.000000e+00 : f32
    %67 = vector.broadcast %cst_51 : f32 to vector<192x21xf32>
    %68 = arith.cmpf oge, %66, %67 : vector<192x21xf32>
    %cst_52 = arith.constant 0.00999999977 : f32
    %69 = vector.broadcast %cst_52 : f32 to vector<192x21xf32>
    %70 = arith.mulf %69, %66 : vector<192x21xf32>
    %71 = arith.select %68, %66, %70 : vector<192x21xi1>, vector<192x21xf32>
    %72 = arith.truncf %71 : vector<192x21xf32> to vector<192x21xbf16>
    %73 = vector.extract_strided_slice %72 {offsets = [0, 0], sizes = [16, 21], strides = [1, 1]} : vector<192x21xbf16> to vector<16x21xbf16>
    %c0_53 = arith.constant 0 : index
    %c0_54 = arith.constant 0 : index
    %c0_55 = arith.constant 0 : index
    %74 = vector.load %arg6[%c0_53, %c0_54, %c0_55] : memref<12x21x32xbf16, #tpu.memory_space<vmem>>, vector<1x21x32xbf16>
    %75 = vector.shape_cast %74 : vector<1x21x32xbf16> to vector<21x32xbf16>
    %cst_56 = arith.constant dense<0.000000e+00> : vector<16x32xf32>
    %76 = tpu.matmul %73, %75, %cst_56 {dimension_numbers = #tpu.dot_dimension_numbers<[1], [0], [0], [1], [0, 0, 1, 1], [], []>} : vector<16x21xbf16>, vector<21x32xbf16>, vector<16x32xf32> -> vector<16x32xf32>
    %77 = vector.extract_strided_slice %72 {offsets = [16, 0], sizes = [16, 21], strides = [1, 1]} : vector<192x21xbf16> to vector<16x21xbf16>
    %c1_57 = arith.constant 1 : index
    %c0_58 = arith.constant 0 : index
    %c0_59 = arith.constant 0 : index
    %78 = vector.load %arg6[%c1_57, %c0_58, %c0_59] : memref<12x21x32xbf16, #tpu.memory_space<vmem>>, vector<1x21x32xbf16>
    %79 = vector.shape_cast %78 : vector<1x21x32xbf16> to vector<21x32xbf16>
    %cst_60 = arith.constant dense<0.000000e+00> : vector<16x32xf32>
    %80 = tpu.matmul %77, %79, %cst_60 {dimension_numbers = #tpu.dot_dimension_numbers<[1], [0], [0], [1], [0, 0, 1, 1], [], []>} : vector<16x21xbf16>, vector<21x32xbf16>, vector<16x32xf32> -> vector<16x32xf32>
    %81 = arith.addf %76, %80 : vector<16x32xf32>
    %82 = vector.extract_strided_slice %72 {offsets = [32, 0], sizes = [16, 21], strides = [1, 1]} : vector<192x21xbf16> to vector<16x21xbf16>
    %c2_61 = arith.constant 2 : index
    %c0_62 = arith.constant 0 : index
    %c0_63 = arith.constant 0 : index
    %83 = vector.load %arg6[%c2_61, %c0_62, %c0_63] : memref<12x21x32xbf16, #tpu.memory_space<vmem>>, vector<1x21x32xbf16>
    %84 = vector.shape_cast %83 : vector<1x21x32xbf16> to vector<21x32xbf16>
    %cst_64 = arith.constant dense<0.000000e+00> : vector<16x32xf32>
    %85 = tpu.matmul %82, %84, %cst_64 {dimension_numbers = #tpu.dot_dimension_numbers<[1], [0], [0], [1], [0, 0, 1, 1], [], []>} : vector<16x21xbf16>, vector<21x32xbf16>, vector<16x32xf32> -> vector<16x32xf32>
    %86 = arith.addf %81, %85 : vector<16x32xf32>
    %87 = vector.extract_strided_slice %72 {offsets = [48, 0], sizes = [16, 21], strides = [1, 1]} : vector<192x21xbf16> to vector<16x21xbf16>
    %c3_65 = arith.constant 3 : index
    %c0_66 = arith.constant 0 : index
    %c0_67 = arith.constant 0 : index
    %88 = vector.load %arg6[%c3_65, %c0_66, %c0_67] : memref<12x21x32xbf16, #tpu.memory_space<vmem>>, vector<1x21x32xbf16>
    %89 = vector.shape_cast %88 : vector<1x21x32xbf16> to vector<21x32xbf16>
    %cst_68 = arith.constant dense<0.000000e+00> : vector<16x32xf32>
    %90 = tpu.matmul %87, %89, %cst_68 {dimension_numbers = #tpu.dot_dimension_numbers<[1], [0], [0], [1], [0, 0, 1, 1], [], []>} : vector<16x21xbf16>, vector<21x32xbf16>, vector<16x32xf32> -> vector<16x32xf32>
    %91 = arith.addf %86, %90 : vector<16x32xf32>
    %92 = vector.extract_strided_slice %72 {offsets = [64, 0], sizes = [16, 21], strides = [1, 1]} : vector<192x21xbf16> to vector<16x21xbf16>
    %c4 = arith.constant 4 : index
    %c0_69 = arith.constant 0 : index
    %c0_70 = arith.constant 0 : index
    %93 = vector.load %arg6[%c4, %c0_69, %c0_70] : memref<12x21x32xbf16, #tpu.memory_space<vmem>>, vector<1x21x32xbf16>
    %94 = vector.shape_cast %93 : vector<1x21x32xbf16> to vector<21x32xbf16>
    %cst_71 = arith.constant dense<0.000000e+00> : vector<16x32xf32>
    %95 = tpu.matmul %92, %94, %cst_71 {dimension_numbers = #tpu.dot_dimension_numbers<[1], [0], [0], [1], [0, 0, 1, 1], [], []>} : vector<16x21xbf16>, vector<21x32xbf16>, vector<16x32xf32> -> vector<16x32xf32>
    %96 = arith.addf %91, %95 : vector<16x32xf32>
    %97 = vector.extract_strided_slice %72 {offsets = [80, 0], sizes = [16, 21], strides = [1, 1]} : vector<192x21xbf16> to vector<16x21xbf16>
    %c5 = arith.constant 5 : index
    %c0_72 = arith.constant 0 : index
    %c0_73 = arith.constant 0 : index
    %98 = vector.load %arg6[%c5, %c0_72, %c0_73] : memref<12x21x32xbf16, #tpu.memory_space<vmem>>, vector<1x21x32xbf16>
    %99 = vector.shape_cast %98 : vector<1x21x32xbf16> to vector<21x32xbf16>
    %cst_74 = arith.constant dense<0.000000e+00> : vector<16x32xf32>
    %100 = tpu.matmul %97, %99, %cst_74 {dimension_numbers = #tpu.dot_dimension_numbers<[1], [0], [0], [1], [0, 0, 1, 1], [], []>} : vector<16x21xbf16>, vector<21x32xbf16>, vector<16x32xf32> -> vector<16x32xf32>
    %101 = arith.addf %96, %100 : vector<16x32xf32>
    %102 = vector.extract_strided_slice %72 {offsets = [96, 0], sizes = [16, 21], strides = [1, 1]} : vector<192x21xbf16> to vector<16x21xbf16>
    %c6 = arith.constant 6 : index
    %c0_75 = arith.constant 0 : index
    %c0_76 = arith.constant 0 : index
    %103 = vector.load %arg6[%c6, %c0_75, %c0_76] : memref<12x21x32xbf16, #tpu.memory_space<vmem>>, vector<1x21x32xbf16>
    %104 = vector.shape_cast %103 : vector<1x21x32xbf16> to vector<21x32xbf16>
    %cst_77 = arith.constant dense<0.000000e+00> : vector<16x32xf32>
    %105 = tpu.matmul %102, %104, %cst_77 {dimension_numbers = #tpu.dot_dimension_numbers<[1], [0], [0], [1], [0, 0, 1, 1], [], []>} : vector<16x21xbf16>, vector<21x32xbf16>, vector<16x32xf32> -> vector<16x32xf32>
    %106 = arith.addf %101, %105 : vector<16x32xf32>
    %107 = vector.extract_strided_slice %72 {offsets = [112, 0], sizes = [16, 21], strides = [1, 1]} : vector<192x21xbf16> to vector<16x21xbf16>
    %c7 = arith.constant 7 : index
    %c0_78 = arith.constant 0 : index
    %c0_79 = arith.constant 0 : index
    %108 = vector.load %arg6[%c7, %c0_78, %c0_79] : memref<12x21x32xbf16, #tpu.memory_space<vmem>>, vector<1x21x32xbf16>
    %109 = vector.shape_cast %108 : vector<1x21x32xbf16> to vector<21x32xbf16>
    %cst_80 = arith.constant dense<0.000000e+00> : vector<16x32xf32>
    %110 = tpu.matmul %107, %109, %cst_80 {dimension_numbers = #tpu.dot_dimension_numbers<[1], [0], [0], [1], [0, 0, 1, 1], [], []>} : vector<16x21xbf16>, vector<21x32xbf16>, vector<16x32xf32> -> vector<16x32xf32>
    %111 = arith.addf %106, %110 : vector<16x32xf32>
    %112 = vector.extract_strided_slice %72 {offsets = [128, 0], sizes = [16, 21], strides = [1, 1]} : vector<192x21xbf16> to vector<16x21xbf16>
    %c8 = arith.constant 8 : index
    %c0_81 = arith.constant 0 : index
    %c0_82 = arith.constant 0 : index
    %113 = vector.load %arg6[%c8, %c0_81, %c0_82] : memref<12x21x32xbf16, #tpu.memory_space<vmem>>, vector<1x21x32xbf16>
    %114 = vector.shape_cast %113 : vector<1x21x32xbf16> to vector<21x32xbf16>
    %cst_83 = arith.constant dense<0.000000e+00> : vector<16x32xf32>
    %115 = tpu.matmul %112, %114, %cst_83 {dimension_numbers = #tpu.dot_dimension_numbers<[1], [0], [0], [1], [0, 0, 1, 1], [], []>} : vector<16x21xbf16>, vector<21x32xbf16>, vector<16x32xf32> -> vector<16x32xf32>
    %116 = arith.addf %111, %115 : vector<16x32xf32>
    %117 = vector.extract_strided_slice %72 {offsets = [144, 0], sizes = [16, 21], strides = [1, 1]} : vector<192x21xbf16> to vector<16x21xbf16>
    %c9 = arith.constant 9 : index
    %c0_84 = arith.constant 0 : index
    %c0_85 = arith.constant 0 : index
    %118 = vector.load %arg6[%c9, %c0_84, %c0_85] : memref<12x21x32xbf16, #tpu.memory_space<vmem>>, vector<1x21x32xbf16>
    %119 = vector.shape_cast %118 : vector<1x21x32xbf16> to vector<21x32xbf16>
    %cst_86 = arith.constant dense<0.000000e+00> : vector<16x32xf32>
    %120 = tpu.matmul %117, %119, %cst_86 {dimension_numbers = #tpu.dot_dimension_numbers<[1], [0], [0], [1], [0, 0, 1, 1], [], []>} : vector<16x21xbf16>, vector<21x32xbf16>, vector<16x32xf32> -> vector<16x32xf32>
    %121 = arith.addf %116, %120 : vector<16x32xf32>
    %122 = vector.extract_strided_slice %72 {offsets = [160, 0], sizes = [16, 21], strides = [1, 1]} : vector<192x21xbf16> to vector<16x21xbf16>
    %c10 = arith.constant 10 : index
    %c0_87 = arith.constant 0 : index
    %c0_88 = arith.constant 0 : index
    %123 = vector.load %arg6[%c10, %c0_87, %c0_88] : memref<12x21x32xbf16, #tpu.memory_space<vmem>>, vector<1x21x32xbf16>
    %124 = vector.shape_cast %123 : vector<1x21x32xbf16> to vector<21x32xbf16>
    %cst_89 = arith.constant dense<0.000000e+00> : vector<16x32xf32>
    %125 = tpu.matmul %122, %124, %cst_89 {dimension_numbers = #tpu.dot_dimension_numbers<[1], [0], [0], [1], [0, 0, 1, 1], [], []>} : vector<16x21xbf16>, vector<21x32xbf16>, vector<16x32xf32> -> vector<16x32xf32>
    %126 = arith.addf %121, %125 : vector<16x32xf32>
    %127 = vector.extract_strided_slice %72 {offsets = [176, 0], sizes = [16, 21], strides = [1, 1]} : vector<192x21xbf16> to vector<16x21xbf16>
    %c11 = arith.constant 11 : index
    %c0_90 = arith.constant 0 : index
    %c0_91 = arith.constant 0 : index
    %128 = vector.load %arg6[%c11, %c0_90, %c0_91] : memref<12x21x32xbf16, #tpu.memory_space<vmem>>, vector<1x21x32xbf16>
    %129 = vector.shape_cast %128 : vector<1x21x32xbf16> to vector<21x32xbf16>
    %cst_92 = arith.constant dense<0.000000e+00> : vector<16x32xf32>
    %130 = tpu.matmul %127, %129, %cst_92 {dimension_numbers = #tpu.dot_dimension_numbers<[1], [0], [0], [1], [0, 0, 1, 1], [], []>} : vector<16x21xbf16>, vector<21x32xbf16>, vector<16x32xf32> -> vector<16x32xf32>
    %131 = arith.addf %126, %130 : vector<16x32xf32>
    %c0_93 = arith.constant 0 : index
    %c0_94 = arith.constant 0 : index
    %132 = vector.load %arg7[%c0_93, %c0_94] : memref<1x32xf32, #tpu.memory_space<vmem>>, vector<1x32xf32>
    %133 = vector.broadcast %132 : vector<1x32xf32> to vector<16x32xf32>
    %134 = arith.addf %131, %133 : vector<16x32xf32>
    %cst_95 = arith.constant 0.000000e+00 : f32
    %135 = vector.broadcast %cst_95 : f32 to vector<16x32xf32>
    %136 = arith.maximumf %134, %135 : vector<16x32xf32>
    %137 = arith.truncf %136 : vector<16x32xf32> to vector<16x32xbf16>
    %c0_96 = arith.constant 0 : index
    %c0_97 = arith.constant 0 : index
    %138 = vector.load %arg8[%c0_96, %c0_97] : memref<32x2xbf16, #tpu.memory_space<vmem>>, vector<32x2xbf16>
    %cst_98 = arith.constant dense<0.000000e+00> : vector<16x2xf32>
    %139 = tpu.matmul %137, %138, %cst_98 {dimension_numbers = #tpu.dot_dimension_numbers<[1], [0], [0], [1], [0, 0, 1, 1], [], []>} : vector<16x32xbf16>, vector<32x2xbf16>, vector<16x2xf32> -> vector<16x2xf32>
    %c0_99 = arith.constant 0 : index
    %c0_100 = arith.constant 0 : index
    %140 = vector.load %arg9[%c0_99, %c0_100] : memref<1x2xf32, #tpu.memory_space<vmem>>, vector<1x2xf32>
    %141 = vector.broadcast %140 : vector<1x2xf32> to vector<16x2xf32>
    %142 = arith.addf %139, %141 : vector<16x2xf32>
    %c0_101 = arith.constant 0 : index
    %c0_102 = arith.constant 0 : index
    %143 = vector.load %arg10[%c0_101, %c0_102] : memref<16x2xf32, #tpu.memory_space<vmem>>, vector<16x2xf32>
    tpu.vector_store %arg10[%c0_101, %c0_102], %142 {strides = array<i32>} : memref<16x2xf32, #tpu.memory_space<vmem>>, vector<16x2xf32>,
    return
  }
  func.func @transform_0(%arg0: i32) -> (i32, i32) {
    %c0_i32 = arith.constant 0 : i32
    %c0_i32_0 = arith.constant 0 : i32
    return %arg0, %c0_i32 : i32, i32
  }
  func.func @transform_1(%arg0: i32) -> (i32, i32, i32) {
    %c0_i32 = arith.constant 0 : i32
    %c0_i32_0 = arith.constant 0 : i32
    %c0_i32_1 = arith.constant 0 : i32
    %c0_i32_2 = arith.constant 0 : i32
    return %c0_i32, %c0_i32_0, %c0_i32_1 : i32, i32, i32
  }
  func.func @transform_2(%arg0: i32) -> (i32, i32) {
    %c0_i32 = arith.constant 0 : i32
    %c0_i32_0 = arith.constant 0 : i32
    %c0_i32_1 = arith.constant 0 : i32
    return %c0_i32, %c0_i32_0 : i32, i32
  }
  func.func @transform_3(%arg0: i32) -> (i32, i32, i32) {
    %c0_i32 = arith.constant 0 : i32
    %c0_i32_0 = arith.constant 0 : i32
    %c0_i32_1 = arith.constant 0 : i32
    %c0_i32_2 = arith.constant 0 : i32
    return %c0_i32, %c0_i32_0, %c0_i32_1 : i32, i32, i32
  }
  func.func @transform_4(%arg0: i32) -> (i32, i32) {
    %c0_i32 = arith.constant 0 : i32
    %c0_i32_0 = arith.constant 0 : i32
    %c0_i32_1 = arith.constant 0 : i32
    return %c0_i32, %c0_i32_0 : i32, i32
  }
  func.func @transform_5(%arg0: i32) -> (i32, i32, i32) {
    %c0_i32 = arith.constant 0 : i32
    %c0_i32_0 = arith.constant 0 : i32
    %c0_i32_1 = arith.constant 0 : i32
    %c0_i32_2 = arith.constant 0 : i32
    return %c0_i32, %c0_i32_0, %c0_i32_1 : i32, i32, i32
  }
  func.func @transform_6(%arg0: i32) -> (i32, i32) {
    %c0_i32 = arith.constant 0 : i32
    %c0_i32_0 = arith.constant 0 : i32
    %c0_i32_1 = arith.constant 0 : i32
    return %c0_i32, %c0_i32_0 : i32, i32
  }
  func.func @transform_7(%arg0: i32) -> (i32, i32) {
    %c0_i32 = arith.constant 0 : i32
    %c0_i32_0 = arith.constant 0 : i32
    %c0_i32_1 = arith.constant 0 : i32
    return %c0_i32, %c0_i32_0 : i32, i32
  }
  func.func @transform_8(%arg0: i32) -> (i32, i32) {
    %c0_i32 = arith.constant 0 : i32
    %c0_i32_0 = arith.constant 0 : i32
    %c0_i32_1 = arith.constant 0 : i32
    return %c0_i32, %c0_i32_0 : i32, i32
  }
  func.func @transform_9(%arg0: i32) -> (i32, i32) {
    %c0_i32 = arith.constant 0 : i32
    %c0_i32_0 = arith.constant 0 : i32
    return %arg0, %c0_i32 : i32, i32
  }
}

</mosaic_0001>

<bundles_post_ra>
// kernel: tpu_custom_call.1
= control target key start
LH: loop header
LB: loop body
LE: loop exit
PB: predicated region body
PF: predicated region fallthrough
CT: control target
= control target key end

     0   :  { %s4755_s30 = smov 0   ;;  %s5705_s0 = inlined_call_operand.vmem [shape: bf16[128,65], index: 0, kind: input, shape index: {}]   ;;  %s5706_s1 = inlined_call_operand.vmem [shape: bf16[4,65,181], index: 1, kind: input, shape index: {}]   ;;  %s5707_s2 = inlined_call_operand.vmem [shape: bf16[181,21], index: 2, kind: input, shape index: {}]   ;;  %s5708_s3 = inlined_call_operand.vmem [shape: bf16[4,192,64], index: 3, kind: input, shape index: {}]   ;;  %s5709_s4 = inlined_call_operand.vmem [shape: f32[192,1], index: 4, kind: input, shape index: {}]   ;;  %s5710_s5 = inlined_call_operand.vmem [shape: bf16[12,21,32], index: 5, kind: input, shape index: {}]   ;;  %s5711_s6 = inlined_call_operand.vmem [shape: f32[1,32], index: 6, kind: input, shape index: {}]   ;;  %s5712_s7 = inlined_call_operand.vmem [shape: bf16[32,2], index: 7, kind: input, shape index: {}]   ;;  %s5713_s8 = inlined_call_operand.vmem [shape: f32[1,2], index: 8, kind: input, shape index: {}]   ;;  %s5714_s9 = inlined_call_operand.vmem [shape: f32[32,2], index: 9, kind: output, shape index: {}]  }
   0x1 LB: > { %s3743_s10 = sadd.s32 4294967295, %s4699_s30   ;;  %p3747_p0 = scmp.ge.s32.totalorder %s4699_s30, 1  ;;  %s4699_s30 = sphi %s4755_s30, %s19_s30  }
   0x2   : > { %p288_p1 = scmp.lt.s32.totalorder %s4699_s30, 3 }
   0x4   : > { %p289_p2 = pnand %p3747_p0, %p288_p1 }
   0x5   : > { %v4532_v0 = vld [vmem:[%s5706_s1 + $0x4] ss:$8 sps:$4 sm:$0xff] (!%p289_p2)   ;;  %v4534_v1 = vld [vmem:[%s5706_s1] ss:$8 sps:$4 sm:$0xff] (!%p289_p2)   ;;  %v4701_v2 = vmov (!%p289_p2), 0   ;;  %s3748_s15 = sshll.u32 (!%p289_p2), %s3743_s10, 3 }
   0x6   : > { %292 = sbr.rel (%p289_p2) target bundleno = 1819 (0x71b), region = 56  ;;  %473 = vmatprep.mubr.bf16.mxu0 (!%p289_p2), %v4701_v2  ;;  %682 = vmatprep.subr.bf16.mxu1 (!%p289_p2), %v4701_v2  ;;  %v4535_v3 = vld [vmem:[%s5706_s1 + $0x14] ss:$8 sps:$4 sm:$0xff] (!%p289_p2)   ;;  %p325_p3 = scmp.lt.s32.totalorder (!%p289_p2), %s3748_s15, 15  ;;  %v4537_v4 = vld [vmem:[%s5706_s1 + $0x10] ss:$8 sps:$4 sm:$0xff] (!%p289_p2)  }
   0x7   : > { %441 = vmatprep.subr.bf16.mxu0 (!%p289_p2), %v4532_v0  ;;  %4530 = vset.pattern.permute.xlu0 (!%p289_p2), %v4701_v2  ;;  %v4538_v5 = vld [vmem:[%s5706_s1 + $0x24] ss:$8 sps:$4 sm:$0xff] (!%p289_p2)   ;;  %vm432_vm0 = vcmask (!%p289_p2), 1040384   ;;  %v4540_v7 = vld [vmem:[%s5706_s1 + $0x20] ss:$8 sps:$4 sm:$0xff] (!%p289_p2)   ;;  %vm419_vm1 = vcmask (!%p289_p2), 531456  }
   0x8   : > { %442 = vmatpush1.bf16.msra.mxu0 (!%p289_p2), %v4534_v1  ;;  %4531 = vset.pattern.permute.xlu1 (!%p289_p2), %v4701_v2  ;;  %v353_v6 = vld [vmem:[%s5706_s1 + $0x40] sm:$0x11] (!%p289_p2)  ;;  %v4541_v8 = vld [vmem:[%s5706_s1 + $0x34] ss:$8 sps:$4 sm:$0xff] (!%p289_p2)   ;;  %v4799_v10 = vsel (!%p289_p2), %vm432_vm0, 65535, %v4701_v2  ;;  %v4821_v18 = vld [vmem:[%s5707_s2 + $0x8] sm:$0xff] (!%p289_p2)  }
   0x9   : > { %443 = vmatprep.subr.bf16.mxu0 (!%p289_p2), %v4535_v3  ;;  %v3765_v9 = vcombine.high (!%p289_p2), %v353_v6, %v353_v6  ;;  %v4543_v11 = vld [vmem:[%s5706_s1 + $0x30] ss:$8 sps:$4 sm:$0xff] (!%p289_p2)   ;;  %v3764_v12 = vcombine.low (!%p289_p2), %v353_v6, %v353_v6  ;;  %v4551_v15 = vld [vmem:[%s5706_s1 + $0x4c] ss:$8 sps:$4 sm:$0xff] (!%p289_p2)   ;;  %v4812_v16 = vld [vmem:[%s5707_s2] sm:$0xff] (!%p289_p2)   ;;  %vm675_vm2 = vcmask (!%p289_p2), 1041408  }
   0xa   : > { %683 = vmatpush1.bf16.msra.mxu1 (!%p289_p2), %v4812_v16  ;;  %v4549_v19 = vld [vmem:[%s5706_s1 + $0x48] ss:$8 sps:$4 sm:$0xff] (!%p289_p2)   ;;  %v4554_v20 = vld [vmem:[%s5706_s1 + $0x5c] ss:$8 sps:$4 sm:$0xff] (!%p289_p2)   ;;  %v4552_v21 = vld [vmem:[%s5706_s1 + $0x58] ss:$8 sps:$4 sm:$0xff] (!%p289_p2)  }
   0xb   : > { %v439_v13 = vand.u32 (!%p289_p2), %v3765_v9, %v4799_v10  ;;  %v436_v14 = vand.u32 (!%p289_p2), %v3764_v12, %v4799_v10  ;;  %684 = vmatprep.subr.bf16.mxu1 (!%p289_p2), %v4701_v2  ;;  %v4839_v22 = vld [vmem:[%s5707_s2 + $0x10] sm:$0xff] (!%p289_p2)   ;;  %v3794_v25 = vld [vmem:[%s5706_s1 + $0x88] sm:$0x11] (!%p289_p2)  ;;  %v4858_v27 = vld [vmem:[%s5707_s2 + $0x18] sm:$0xff] (!%p289_p2)   ;;  %vm676_vm3 = vcmask (!%p289_p2), 1042432   ;;  %v4702_v44 = vmov (!%p289_p2), 65535  }
   0xc   : > { %444 = vmatpush1.bf16.msra.mxu0 (!%p289_p2), %v4537_v4  ;;  %v4558_v23 = vld [vmem:[%s5706_s1 + $0x6c] ss:$8 sps:$4 sm:$0xff] (!%p289_p2)   ;;  %v4556_v26 = vld [vmem:[%s5706_s1 + $0x68] ss:$8 sps:$4 sm:$0xff] (!%p289_p2)   ;;  %v4561_v28 = vld [vmem:[%s5706_s1 + $0x7c] ss:$8 sps:$4 sm:$0xff] (!%p289_p2)   ;;  %v3804_v29 = vcombine.high (!%p289_p2), %v3794_v25, %v3794_v25  ;;  %v3803_v32 = vcombine.low (!%p289_p2), %v3794_v25, %v3794_v25 }
   0xd   : > { %s5716_s15 = smov (!%p325_p3, %s3748_s15), 15  ;;  %445 = vmatprep.subr.bf16.mxu0 %v4538_v5  ;;  %v4868_v30 = vld [vmem:[%s5707_s2 + $0x20] sm:$0xff]   ;;  %v4885_v35 = vld [vmem:[%s5707_s2 + $0x28] sm:$0xff]   ;;  %v4893_v37 = vld [vmem:[%s5707_s2 + $0x30] sm:$0xff]   ;;  %v677_v45 = vsel %vm675_vm2, 4294967295, %v4702_v44  ;;  %vm662_vm8 = vcmask 433152  }
   0xe   : > { %s3749_s24 = sshll.u32 %s5716_s15, 2  ;;  %685 = vmatpush1.bf16.msra.mxu1 %v4821_v18  ;;  %v4559_v31 = vld [vmem:[%s5706_s1 + $0x78] ss:$8 sps:$4 sm:$0xff]   ;;  %v834_v34 = vand.u32 %v3804_v29, %v4799_v10  ;;  %v831_v36 = vand.u32 %v3803_v32, %v4799_v10  ;;  %v4923_v41 = vld [vmem:[%s5707_s2 + $0x48] sm:$0xff]   ;;  %v4943_v42 = vld [vmem:[%s5707_s2 + $0x50] sm:$0xff]   ;;  %v4950_v46 = vsel %vm676_vm3, %v677_v45, 0 }
   0xf   : > { %s4793_s29 = scalar_lea.vmem %s5705_s0, %s3749_s24  ;;  %686 = vmatprep.subr.bf16.mxu1 %v4701_v2  ;;  %v4906_v39 = vld [vmem:[%s5707_s2 + $0x38] sm:$0xff]   ;;  %v4913_v40 = vld [vmem:[%s5707_s2 + $0x40] sm:$0xff]   ;;  %s3750_s15 = sshll.u32 %s3743_s10, 1 }
  0x10   : > { %446 = vmatpush1.bf16.msra.mxu0 %v4540_v7  ;;  %v4815_v17 = vld [vmem:[%s4793_s29] sm:$0xff]   ;;  %v4846_v24 = vld [vmem:[%s4793_s29 + $0x8] sm:$0xff]   ;;  %v4878_v33 = vld [vmem:[%s4793_s29 + $0x10] sm:$0xff]   ;;  %p331_p4 = scmp.lt.s32.totalorder %s3750_s15, 3 }
  0x11   : > { %447 = vmatprep.subr.bf16.mxu0 %v4541_v8  ;;  %v4900_v38 = vld [vmem:[%s4793_s29 + $0x18] sm:$0xff]  }
  0x12   : > { %687 = vmatpush1.bf16.msra.mxu1 %v4839_v22  ;;  %v4575_v43 = vld [vmem:[%s5707_s2 + $0x58] ss:$0 sps:$4 sm:$0x77]   ;;  %s5718_s15 = smov (!%p331_p4, %s3750_s15), 3 }
  0x13   : > { %688 = vmatprep.subr.bf16.mxu1 %v4701_v2  ;;  %v4953_v47 = vand.u32 %v4575_v43, %v4950_v46  ;;  %s3751_s16 = sshll.u32 %s5718_s15, 3 }
  0x14   : > { %448 = vmatpush1.bf16.msra.mxu0 %v4543_v11  ;;  %s334_s21 = scalar_lea.vmem %s5714_s9, %s3751_s16 }
  0x15   : > { %449 = vmatprep.subr.bf16.mxu0 %v439_v13 }
  0x16   : > { %689 = vmatpush1.bf16.msra.mxu1 %v4858_v27 }
  0x17   : > { %690 = vmatprep.subr.bf16.mxu1 %v4701_v2 }
  0x18   : > { %450 = vmatpush1.bf16.msra.mxu0 %v436_v14 }
  0x19   : > { %836 = vmatprep.subr.bf16.mxu0 %v4551_v15 }
  0x1a   : > { %691 = vmatpush1.bf16.msra.mxu1 %v4868_v30 }
  0x1b   : > { %3766 = vmatmul.mubr.msk.bf16.vlgmr.msra.gmra.mrb[0].mxu0 %vm419_vm1, %v4815_v17  ;;  %692 = vmatprep.subr.bf16.mxu1 %v4701_v2 }
  0x1c   : > { %483 = vmatprep.mubr.bf16.mxu0 %v4701_v2  ;;  %837 = vmatpush1.bf16.msra.mxu0 %v4549_v19 }
  0x1d   : > { %838 = vmatprep.subr.bf16.mxu0 %v4554_v20 }
  0x1e   : > { %693 = vmatpush1.bf16.msra.mxu1 %v4885_v35 }
  0x1f   : > { %694 = vmatprep.subr.bf16.mxu1 %v4701_v2 }
  0x20   : > { %839 = vmatpush1.bf16.msra.mxu0 %v4552_v21 }
  0x21   : > { %840 = vmatprep.subr.bf16.mxu0 %v4558_v23 }
  0x22   : > { %695 = vmatpush1.bf16.msra.mxu1 %v4893_v37 }
  0x23   : > { %3767 = vmatmul.mubr.msk.bf16.gmra.mrb[4].mxu0 %vm419_vm1, %v4846_v24  ;;  %696 = vmatprep.subr.bf16.mxu1 %v4701_v2 }
  0x24   : > { %493 = vmatprep.mubr.bf16.mxu0 %v4701_v2  ;;  %841 = vmatpush1.bf16.msra.mxu0 %v4556_v26 }
  0x25   : > { %842 = vmatprep.subr.bf16.mxu0 %v4561_v28 }
  0x26   : > { %697 = vmatpush1.bf16.msra.mxu1 %v4906_v39 }
  0x27   : > { %698 = vmatprep.subr.bf16.mxu1 %v4701_v2 }
  0x28   : > { %843 = vmatpush1.bf16.msra.mxu0 %v4559_v31 }
  0x29   : > { %844 = vmatprep.subr.bf16.mxu0 %v834_v34 }
  0x2a   : > { %699 = vmatpush1.bf16.msra.mxu1 %v4913_v40 }
  0x2b   : > { %3768 = vmatmul.mubr.msk.bf16.gmra.mrb[8].mxu0 %vm419_vm1, %v4878_v33  ;;  %700 = vmatprep.subr.bf16.mxu1 %v4701_v2 }
  0x2c   : > { %503 = vmatprep.mubr.bf16.mxu0 %v4701_v2  ;;  %845 = vmatpush1.bf16.msra.mxu0 %v831_v36 }
  0x2e   : > { %701 = vmatpush1.bf16.msra.mxu1 %v4923_v41 }
  0x2f   : > { %702 = vmatprep.subr.bf16.mxu1 %v4701_v2 }
  0x32   : > { %703 = vmatpush1.bf16.msra.mxu1 %v4943_v42 }
  0x33   : > { %3769 = vmatmul.mubr.msk.bf16.gmra.mrb[12].mxu0 %vm419_vm1, %v4900_v38  ;;  %704 = vmatprep.subr.bf16.mxu1 %v4701_v2 }
  0x34   : > { %868 = vmatprep.mubr.bf16.mxu0 %v4701_v2 }
  0x36   : > { %705 = vmatpush1.bf16.msra.mxu1 %v4953_v47 }
  0x37   : > { %977 = vmatprep.subr.bf16.mxu1 %v4701_v2 }
  0x3b   : > { %3805 = vmatmul.mubr.msk.bf16.vlgmr.msra.gmra.mrb[16].mxu0 %vm419_vm1, %v4815_v17 }
  0x3c   : > { %878 = vmatprep.mubr.bf16.mxu0 %v4701_v2 }
  0x43   : > { %3806 = vmatmul.mubr.msk.bf16.gmra.mrb[20].mxu0 %vm419_vm1, %v4846_v24 }
  0x44   : > { %888 = vmatprep.mubr.bf16.mxu0 %v4701_v2 }
  0x4b   : > { %3807 = vmatmul.mubr.msk.bf16.gmra.mrb[24].mxu0 %vm419_vm1, %v4878_v33 }
  0x4c   : > { %898 = vmatprep.mubr.bf16.mxu0 %v4701_v2 }
  0x53   : > { %3808 = vmatmul.mubr.msk.bf16.gmra.mrb[28].mxu0 %vm419_vm1, %v4900_v38 }
  0xee   : > { %v475_v48 = vpop.f32.mrb[0].mxu0 }
  0xef   : > { %v530_v49 = vmul.f32 0.01, %v475_v48  ;;  %v477_v50 = vpop.f32.mrb[1].mxu0  ;;  %vm514_vm4 = vcmp.ge.f32.partialorder %v475_v48, 0.0 }
  0xf0   : > { %v531_v51 = vmul.f32 0.01, %v477_v50  ;;  %v479_v52 = vpop.f32.mrb[2].mxu0  ;;  %vm515_vm5 = vcmp.ge.f32.partialorder %v477_v50, 0.0 }
  0xf1   : > { %vm516_vm6 = vcmp.ge.f32.partialorder %v479_v52, 0.0  ;;  %v532_v53 = vmul.f32 0.01, %v479_v52  ;;  %v481_v54 = vpop.f32.mrb[3].mxu0  ;;  %v546_v56 = vsel %vm514_vm4, %v475_v48, %v530_v49 }
  0xf2   : > { %vm517_vm7 = vcmp.ge.f32.partialorder %v481_v54, 0.0  ;;  %v533_v55 = vmul.f32 0.01, %v481_v54  ;;  %v547_v58 = vsel %vm515_vm5, %v477_v50, %v531_v51 }
  0xf3   : > { %v548_v57 = vsel %vm516_vm6, %v479_v52, %v532_v53 }
  0xf4   : > { %v549_v59 = vsel %vm517_vm7, %v481_v54, %v533_v55  ;;  %v562_v60 = vpack.c.bf16 %v548_v57, %v546_v56 }
  0xf5   : > { %v563_v61 = vpack.c.bf16 %v549_v59, %v547_v58 }
  0xf6   : > { %v485_v62 = vpop.f32.mrb[4].mxu0 }
  0xf7   : > { %3782 = vmatprep.mubr.msk.bf16.mxu1 %vm662_vm8, %v563_v61  ;;  %vm518_vm9 = vcmp.ge.f32.partialorder %v485_v62, 0.0  ;;  %v534_v63 = vmul.f32 0.01, %v485_v62  ;;  %v487_v0 = vpop.f32.mrb[5].mxu0 }
  0xf8   : > { %715 = vmatmul.mubr.bf16.vlgmr.msra.gmra.mrb[0].mxu1 %v562_v60  ;;  %vm519_vm10 = vcmp.ge.f32.partialorder %v487_v0, 0.0  ;;  %v535_v1 = vmul.f32 0.01, %v487_v0  ;;  %v489_v3 = vpop.f32.mrb[6].mxu0 }
  0xf9   : > { %978 = vmatpush1.bf16.msra.mxu1 %v4812_v16  ;;  %v550_v4 = vsel %vm518_vm9, %v485_v62, %v534_v63  ;;  %vm520_vm11 = vcmp.ge.f32.partialorder %v489_v3, 0.0  ;;  %v536_v5 = vmul.f32 0.01, %v489_v3  ;;  %v491_v6 = vpop.f32.mrb[7].mxu0 }
  0xfa   : > { %979 = vmatprep.subr.bf16.mxu1 %v4701_v2  ;;  %v551_v7 = vsel %vm519_vm10, %v487_v0, %v535_v1  ;;  %vm521_vm12 = vcmp.ge.f32.partialorder %v491_v6, 0.0  ;;  %v537_v8 = vmul.f32 0.01, %v491_v6 }
  0xfb   : > { %v552_v9 = vsel %vm520_vm11, %v489_v3, %v536_v5 }
  0xfc   : > { %v553_v11 = vsel %vm521_vm12, %v491_v6, %v537_v8  ;;  %v564_v12 = vpack.c.bf16 %v552_v9, %v550_v4 }
  0xfd   : > { %980 = vmatpush1.bf16.msra.mxu1 %v4821_v18  ;;  %v565_v13 = vpack.c.bf16 %v553_v11, %v551_v7 }
  0xfe   : > { %981 = vmatprep.subr.bf16.mxu1 %v4701_v2  ;;  %v495_v14 = vpop.f32.mrb[8].mxu0 }
  0xff   : > { %vm522_vm13 = vcmp.ge.f32.partialorder %v495_v14, 0.0  ;;  %v538_v15 = vmul.f32 0.01, %v495_v14  ;;  %v497_v19 = vpop.f32.mrb[9].mxu0  ;;  %3783 = vmatprep.mubr.msk.bf16.mxu1 %vm662_vm8, %v565_v13 }
 0x100   : > { %vm523_vm14 = vcmp.ge.f32.partialorder %v497_v19, 0.0  ;;  %v539_v20 = vmul.f32 0.01, %v497_v19  ;;  %v499_v21 = vpop.f32.mrb[10].mxu0  ;;  %723 = vmatmul.mubr.bf16.gmra.mrb[4].mxu1 %v564_v12 }
 0x101   : > { %982 = vmatpush1.bf16.msra.mxu1 %v4839_v22  ;;  %v554_v23 = vsel %vm522_vm13, %v495_v14, %v538_v15  ;;  %vm524_vm15 = vcmp.ge.f32.partialorder %v499_v21, 0.0  ;;  %v540_v25 = vmul.f32 0.01, %v499_v21  ;;  %v501_v26 = vpop.f32.mrb[11].mxu0 }
 0x102   : > { %983 = vmatprep.subr.bf16.mxu1 %v4701_v2  ;;  %v555_v28 = vsel %vm523_vm14, %v497_v19, %v539_v20  ;;  %vm525_vm0 = vcmp.ge.f32.partialorder %v501_v26, 0.0  ;;  %v541_v29 = vmul.f32 0.01, %v501_v26 }
 0x103   : > { %v556_v31 = vsel %vm524_vm15, %v499_v21, %v540_v25 }
 0x104   : > { %v557_v32 = vsel %vm525_vm0, %v501_v26, %v541_v29  ;;  %v566_v34 = vpack.c.bf16 %v556_v31, %v554_v23 }
 0x105   : > { %984 = vmatpush1.bf16.msra.mxu1 %v4858_v27  ;;  %v567_v36 = vpack.c.bf16 %v557_v32, %v555_v28 }
 0x106   : > { %985 = vmatprep.subr.bf16.mxu1 %v4701_v2  ;;  %v505_v43 = vpop.f32.mrb[12].mxu0 }
 0x107   : > { %vm526_vm2 = vcmp.ge.f32.partialorder %v505_v43, 0.0  ;;  %v542_v44 = vmul.f32 0.01, %v505_v43  ;;  %v507_v45 = vpop.f32.mrb[13].mxu0  ;;  %3784 = vmatprep.mubr.msk.bf16.mxu1 %vm662_vm8, %v567_v36 }
 0x108   : > { %vm527_vm3 = vcmp.ge.f32.partialorder %v507_v45, 0.0  ;;  %v543_v48 = vmul.f32 0.01, %v507_v45  ;;  %v509_v49 = vpop.f32.mrb[14].mxu0  ;;  %731 = vmatmul.mubr.bf16.gmra.mrb[8].mxu1 %v566_v34 }
 0x109   : > { %986 = vmatpush1.bf16.msra.mxu1 %v4868_v30  ;;  %v558_v50 = vsel %vm526_vm2, %v505_v43, %v542_v44  ;;  %vm528_vm4 = vcmp.ge.f32.partialorder %v509_v49, 0.0  ;;  %v544_v51 = vmul.f32 0.01, %v509_v49  ;;  %v511_v52 = vpop.f32.mrb[15].mxu0 }
 0x10a   : > { %987 = vmatprep.subr.bf16.mxu1 %v4701_v2  ;;  %v559_v53 = vsel %vm527_vm3, %v507_v45, %v543_v48  ;;  %vm529_vm5 = vcmp.ge.f32.partialorder %v511_v52, 0.0  ;;  %v545_v54 = vmul.f32 0.01, %v511_v52 }
 0x10b   : > { %v560_v55 = vsel %vm528_vm4, %v509_v49, %v544_v51 }
 0x10c   : > { %v561_v56 = vsel %vm529_vm5, %v511_v52, %v545_v54  ;;  %v568_v57 = vpack.c.bf16 %v560_v55, %v558_v50  ;;  %v4578_v52 = vld [vmem:[%s5706_s1 + $0x94] ss:$8 sps:$4 sm:$0xff]  }
 0x10d   : > { %988 = vmatpush1.bf16.msra.mxu1 %v4885_v35  ;;  %v569_v58 = vpack.c.bf16 %v561_v56, %v559_v53 }
 0x10e   : > { %989 = vmatprep.subr.bf16.mxu1 %v4701_v2  ;;  %v870_v59 = vpop.f32.mrb[16].mxu0 }
 0x10f   : > { %3785 = vmatprep.mubr.msk.bf16.mxu1 %vm662_vm8, %v569_v58  ;;  %vm909_vm6 = vcmp.ge.f32.partialorder %v870_v59, 0.0  ;;  %v925_v60 = vmul.f32 0.01, %v870_v59  ;;  %v872_v61 = vpop.f32.mrb[17].mxu0 }
 0x110   : > { %739 = vmatmul.mubr.bf16.gmra.mrb[12].mxu1 %v568_v57  ;;  %vm910_vm7 = vcmp.ge.f32.partialorder %v872_v61, 0.0  ;;  %v926_v62 = vmul.f32 0.01, %v872_v61  ;;  %v874_v63 = vpop.f32.mrb[18].mxu0  ;;  %v4576_v57 = vld [vmem:[%s5706_s1 + $0x90] ss:$8 sps:$4 sm:$0xff]  }
 0x111   : > { %990 = vmatpush1.bf16.msra.mxu1 %v4893_v37  ;;  %v4974_v0 = vsel %vm909_vm6, %v870_v59, %v925_v60  ;;  %vm911_vm9 = vcmp.ge.f32.partialorder %v874_v63, 0.0  ;;  %v927_v1 = vmul.f32 0.01, %v874_v63  ;;  %v876_v3 = vpop.f32.mrb[19].mxu0  ;;  %v4581_v59 = vld [vmem:[%s5706_s1 + $0xa4] ss:$8 sps:$4 sm:$0xff]  }
 0x112   : > { %991 = vmatprep.subr.bf16.mxu1 %v4701_v2  ;;  %v942_v4 = vsel %vm910_vm7, %v872_v61, %v926_v62  ;;  %vm912_vm10 = vcmp.ge.f32.partialorder %v876_v3, 0.0  ;;  %v928_v5 = vmul.f32 0.01, %v876_v3 }
 0x113   : > { %v943_v6 = vsel %vm911_vm9, %v874_v63, %v927_v1  ;;  %vm1131_vm9 = vcmask 523264  }
 0x114   : > { %v957_v7 = vpack.c.bf16 %v943_v6, %v4974_v0  ;;  %v944_v8 = vsel %vm912_vm10, %v876_v3, %v928_v5 }
 0x115   : > { %992 = vmatpush1.bf16.msra.mxu1 %v4906_v39  ;;  %v958_v9 = vpack.c.bf16 %v944_v8, %v942_v4  ;;  %v4579_v4 = vld [vmem:[%s5706_s1 + $0xa0] ss:$8 sps:$4 sm:$0xff]  }
 0x116   : > { %993 = vmatprep.subr.bf16.mxu1 %v4701_v2  ;;  %v880_v11 = vpop.f32.mrb[20].mxu0 }
 0x117   : > { %vm913_vm11 = vcmp.ge.f32.partialorder %v880_v11, 0.0  ;;  %v929_v12 = vmul.f32 0.01, %v880_v11  ;;  %v882_v13 = vpop.f32.mrb[21].mxu0  ;;  %3809 = vmatprep.mubr.msk.bf16.mxu1 %vm662_vm8, %v958_v9  ;;  %v3893_v9 = vld [vmem:[%s5706_s1 + $0xd0] sm:$0x11] }
 0x118   : > { %vm914_vm12 = vcmp.ge.f32.partialorder %v882_v13, 0.0  ;;  %v930_v14 = vmul.f32 0.01, %v882_v13  ;;  %v884_v15 = vpop.f32.mrb[22].mxu0 }
 0x119   : > { %994 = vmatpush1.bf16.msra.mxu1 %v4913_v40  ;;  %v4982_v19 = vsel %vm913_vm11, %v880_v11, %v929_v12  ;;  %vm915_vm13 = vcmp.ge.f32.partialorder %v884_v15, 0.0  ;;  %v931_v20 = vmul.f32 0.01, %v884_v15  ;;  %v886_v21 = vpop.f32.mrb[23].mxu0 }
 0x11a   : > { %995 = vmatprep.subr.bf16.mxu1 %v4701_v2  ;;  %v946_v23 = vsel %vm914_vm12, %v882_v13, %v930_v14  ;;  %vm916_vm14 = vcmp.ge.f32.partialorder %v886_v21, 0.0  ;;  %v932_v25 = vmul.f32 0.01, %v886_v21  ;;  %v4582_v14 = vld [vmem:[%s5706_s1 + $0xb0] ss:$8 sps:$4 sm:$0xff]  }
 0x11b   : > { %v947_v26 = vsel %vm915_vm13, %v884_v15, %v931_v20  ;;  %v4587_v15 = vld [vmem:[%s5706_s1 + $0xc4] ss:$8 sps:$4 sm:$0xff]   ;;  %v4585_v20 = vld [vmem:[%s5706_s1 + $0xc0] ss:$8 sps:$4 sm:$0xff]  }
 0x11c   : > { %v948_v28 = vsel %vm916_vm14, %v886_v21, %v932_v25  ;;  %v959_v29 = vpack.c.bf16 %v947_v26, %v4982_v19  ;;  %v3903_v19 = vcombine.high %v3893_v9, %v3893_v9  ;;  %v3902_v21 = vcombine.low %v3893_v9, %v3893_v9 }
 0x11d   : > { %996 = vmatpush1.bf16.msra.mxu1 %v4923_v41  ;;  %v960_v31 = vpack.c.bf16 %v948_v28, %v946_v23 }
 0x11e   : > { %997 = vmatprep.subr.bf16.mxu1 %v4701_v2  ;;  %v890_v32 = vpop.f32.mrb[24].mxu0  ;;  %v1581_v23 = vand.u32 %v3903_v19, %v4799_v10  ;;  %v1578_v25 = vand.u32 %v3902_v21, %v4799_v10 }
 0x11f   : > { %vm917_vm15 = vcmp.ge.f32.partialorder %v890_v32, 0.0  ;;  %v933_v34 = vmul.f32 0.01, %v890_v32  ;;  %v892_v36 = vpop.f32.mrb[25].mxu0 }
 0x120   : > { %vm918_vm0 = vcmp.ge.f32.partialorder %v892_v36, 0.0  ;;  %v934_v43 = vmul.f32 0.01, %v892_v36  ;;  %v894_v44 = vpop.f32.mrb[26].mxu0 }
 0x121   : > { %998 = vmatpush1.bf16.msra.mxu1 %v4943_v42  ;;  %v949_v45 = vsel %vm917_vm15, %v890_v32, %v933_v34  ;;  %vm919_vm2 = vcmp.ge.f32.partialorder %v894_v44, 0.0  ;;  %v935_v48 = vmul.f32 0.01, %v894_v44  ;;  %v896_v49 = vpop.f32.mrb[27].mxu0 }
 0x122   : > { %999 = vmatprep.subr.bf16.mxu1 %v4701_v2  ;;  %v950_v50 = vsel %vm918_vm0, %v892_v36, %v934_v43  ;;  %vm920_vm3 = vcmp.ge.f32.partialorder %v896_v49, 0.0  ;;  %v936_v51 = vmul.f32 0.01, %v896_v49 }
 0x123   : > { %v951_v53 = vsel %vm919_vm2, %v894_v44, %v935_v48 }
 0x124   : > { %v952_v54 = vsel %vm920_vm3, %v896_v49, %v936_v51  ;;  %v961_v55 = vpack.c.bf16 %v951_v53, %v949_v45 }
 0x125   : > { %1000 = vmatpush1.bf16.msra.mxu1 %v4953_v47  ;;  %v962_v56 = vpack.c.bf16 %v952_v54, %v950_v50 }
 0x126   : > { %v900_v58 = vpop.f32.mrb[28].mxu0  ;;  %1583 = vmatprep.subr.bf16.mxu1 %v4578_v52 }
 0x127   : > { %vm921_vm4 = vcmp.ge.f32.partialorder %v900_v58, 0.0  ;;  %v937_v60 = vmul.f32 0.01, %v900_v58  ;;  %v902_v61 = vpop.f32.mrb[29].mxu0 }
 0x128   : > { %1010 = vmatmul.mubr.bf16.vlgmr.msra.gmra.mrb[16].mxu1 %v957_v7  ;;  %vm922_vm5 = vcmp.ge.f32.partialorder %v902_v61, 0.0  ;;  %v938_v62 = vmul.f32 0.01, %v902_v61  ;;  %v904_v63 = vpop.f32.mrb[30].mxu0  ;;  %v4584_v7 = vld [vmem:[%s5706_s1 + $0xb4] ss:$8 sps:$4 sm:$0xff]  }
 0x129   : > { %3810 = vmatprep.mubr.msk.bf16.mxu1 %vm662_vm8, %v960_v31  ;;  %v953_v0 = vsel %vm921_vm4, %v900_v58, %v937_v60  ;;  %vm923_vm6 = vcmp.ge.f32.partialorder %v904_v63, 0.0  ;;  %v939_v1 = vmul.f32 0.01, %v904_v63  ;;  %v906_v3 = vpop.f32.mrb[31].mxu0  ;;  %1584 = vmatpush1.bf16.msra.mxu1 %v4576_v57 }
 0x12a   : > { %v954_v5 = vsel %vm922_vm5, %v902_v61, %v938_v62  ;;  %vm924_vm7 = vcmp.ge.f32.partialorder %v906_v3, 0.0  ;;  %v940_v6 = vmul.f32 0.01, %v906_v3  ;;  %1585 = vmatprep.subr.bf16.mxu1 %v4581_v59 }
 0x12b   : > { %v955_v8 = vsel %vm923_vm6, %v904_v63, %v939_v1  ;;  %v4591_v1 = vld [vmem:[%s5708_s3 + $0x68] sm:$0xff]  }
 0x12c   : > { %v956_v11 = vsel %vm924_vm7, %v906_v3, %v940_v6  ;;  %v963_v12 = vpack.c.bf16 %v955_v8, %v953_v0  ;;  %v4606_v3 = vld [vmem:[%s5708_s3 + $0x70] sm:$0xff]  }
 0x12d   : > { %v964_v13 = vpack.c.bf16 %v956_v11, %v954_v5  ;;  %1586 = vmatpush1.bf16.msra.mxu1 %v4579_v4 }
 0x12e   : > { %1587 = vmatprep.subr.bf16.mxu1 %v4584_v7 }
 0x130   : > { %1018 = vmatmul.mubr.bf16.gmra.mrb[20].mxu1 %v959_v29 }
 0x131   : > { %3811 = vmatprep.mubr.msk.bf16.mxu1 %vm662_vm8, %v962_v56  ;;  %1588 = vmatpush1.bf16.msra.mxu1 %v4582_v14 }
 0x132   : > { %1589 = vmatprep.subr.bf16.mxu1 %v4587_v15  ;;  %v4607_v15 = vld [vmem:[%s5708_s3 + $0x78] sm:$0xff]  }
 0x135   : > { %1590 = vmatpush1.bf16.msra.mxu1 %v4585_v20 }
 0x136   : > { %1591 = vmatprep.subr.bf16.mxu1 %v1581_v23 }
 0x138   : > { %1026 = vmatmul.mubr.bf16.gmra.mrb[24].mxu1 %v961_v55 }
 0x139   : > { %3812 = vmatprep.mubr.msk.bf16.mxu1 %vm662_vm8, %v964_v13  ;;  %1592 = vmatpush1.bf16.msra.mxu1 %v1578_v25  ;;  %v4592_v25 = vld [vmem:[%s5706_s1 + $0xd8] ss:$8 sps:$4 sm:$0xff]  }
 0x13a   : > { %1724 = vmatprep.subr.bf16.mxu1 %v4701_v2 }
 0x140   : > { %1034 = vmatmul.mubr.bf16.gmra.mrb[28].mxu1 %v963_v12 }
 0x141   : > { %1615 = vmatprep.mubr.bf16.mxu1 %v4701_v2 }
 0x148   : > { %3904 = vmatmul.mubr.msk.bf16.vlgmr.msra.gmra.mrb[32].mxu1 %vm419_vm1, %v4815_v17  ;;  %v4594_v17 = vld [vmem:[%s5706_s1 + $0xdc] ss:$8 sps:$4 sm:$0xff]  }
 0x149   : > { %1625 = vmatprep.mubr.bf16.mxu1 %v4701_v2  ;;  %1725 = vmatpush1.bf16.msra.mxu1 %v4812_v16  ;;  %v4590_v16 = vld [vmem:[%s5708_s3 + $0x60] sm:$0xff]  }
 0x14a   : > { %1726 = vmatprep.subr.bf16.mxu1 %v4701_v2  ;;  %4222 = vmatprep.mubr.msk.bf16.mxu0 %vm1131_vm9, %v4590_v16 }
 0x14d   : > { %1727 = vmatpush1.bf16.msra.mxu1 %v4821_v18 }
 0x14e   : > { %1728 = vmatprep.subr.bf16.mxu1 %v4701_v2 }
 0x150   : > { %3905 = vmatmul.mubr.msk.bf16.gmra.mrb[36].mxu1 %vm419_vm1, %v4846_v24 }
 0x151   : > { %1635 = vmatprep.mubr.bf16.mxu1 %v4701_v2  ;;  %1729 = vmatpush1.bf16.msra.mxu1 %v4839_v22 }
 0x152   : > { %1730 = vmatprep.subr.bf16.mxu1 %v4701_v2 }
 0x155   : > { %1731 = vmatpush1.bf16.msra.mxu1 %v4858_v27 }
 0x156   : > { %1732 = vmatprep.subr.bf16.mxu1 %v4701_v2 }
 0x158   : > { %3906 = vmatmul.mubr.msk.bf16.gmra.mrb[40].mxu1 %vm419_vm1, %v4878_v33 }
 0x159   : > { %1645 = vmatprep.mubr.bf16.mxu1 %v4701_v2  ;;  %1733 = vmatpush1.bf16.msra.mxu1 %v4868_v30 }
 0x15a   : > { %1734 = vmatprep.subr.bf16.mxu1 %v4701_v2 }
 0x15d   : > { %1735 = vmatpush1.bf16.msra.mxu1 %v4885_v35 }
 0x15e   : > { %1736 = vmatprep.subr.bf16.mxu1 %v4701_v2 }
 0x160   : > { %3907 = vmatmul.mubr.msk.bf16.gmra.mrb[44].mxu1 %vm419_vm1, %v4900_v38 }
 0x161   : > { %1737 = vmatpush1.bf16.msra.mxu1 %v4893_v37 }
 0x162   : > { %1738 = vmatprep.subr.bf16.mxu1 %v4701_v2 }
 0x165   : > { %1739 = vmatpush1.bf16.msra.mxu1 %v4906_v39 }
 0x166   : > { %1740 = vmatprep.subr.bf16.mxu1 %v4701_v2 }
 0x169   : > { %1741 = vmatpush1.bf16.msra.mxu1 %v4913_v40 }
 0x16a   : > { %1742 = vmatprep.subr.bf16.mxu1 %v4701_v2 }
 0x16d   : > { %1743 = vmatpush1.bf16.msra.mxu1 %v4923_v41 }
 0x16e   : > { %1744 = vmatprep.subr.bf16.mxu1 %v4701_v2 }
 0x171   : > { %1745 = vmatpush1.bf16.msra.mxu1 %v4943_v42 }
 0x172   : > { %1746 = vmatprep.subr.bf16.mxu1 %v4701_v2 }
 0x175   : > { %1747 = vmatpush1.bf16.msra.mxu1 %v4953_v47 }
 0x176   : > { %2128 = vmatprep.subr.bf16.mxu1 %v4594_v17  ;;  %v4597_v17 = vld [vmem:[%s5706_s1 + $0xec] ss:$8 sps:$4 sm:$0xff]  }
 0x1cb   : > { %v716_v18 = vpop.f32.mrb[0].mxu1 }
 0x1cc   : > { %v718_v22 = vpop.f32.mrb[1].mxu1 }
 0x1cd   : > { %v719_v24 = vpop.f32.mrb[2].mxu1 }
 0x1ce   : > { %v771_v27 = vpack.c.bf16 %v719_v24, %v716_v18  ;;  %v721_v30 = vpop.f32.mrb[3].mxu1  ;;  %v4608_v18 = vld [vmem:[%s5708_s3 + $0x80] sm:$0xff]  }
 0x1d3   : > { %v724_v33 = vpop.f32.mrb[4].mxu1 }
 0x1d4   : > { %v726_v35 = vpop.f32.mrb[5].mxu1 }
 0x1d5   : > { %v727_v37 = vpop.f32.mrb[6].mxu1 }
 0x1d6   : > { %v5066_v38 = vpack.c.bf16 %v727_v37, %v724_v33  ;;  %v729_v39 = vpop.f32.mrb[7].mxu1  ;;  %v4595_v33 = vld [vmem:[%s5706_s1 + $0xe8] ss:$8 sps:$4 sm:$0xff]  }
 0x1d7   : > { %v4600_v39 = vld [vmem:[%s5706_s1 + $0xfc] ss:$8 sps:$4 sm:$0xff]  }
 0x1db   : > { %v732_v40 = vpop.f32.mrb[8].mxu1 }
 0x1dc   : > { %v734_v41 = vpop.f32.mrb[9].mxu1 }
 0x1dd   : > { %v735_v42 = vpop.f32.mrb[10].mxu1 }
 0x1de   : > { %v5068_v26 = vpack.c.bf16 %v735_v42, %v732_v40  ;;  %v737_v28 = vpop.f32.mrb[11].mxu1  ;;  %v3968_v42 = vld [vmem:[%s5706_s1 + $0x118] sm:$0x11] }
 0x1e3   : > { %v740_v29 = vpop.f32.mrb[12].mxu1 }
 0x1e4   : > { %v742_v31 = vpop.f32.mrb[13].mxu1 }
 0x1e5   : > { %v743_v32 = vpop.f32.mrb[14].mxu1 }
 0x1e6   : > { %v5070_v34 = vpack.c.bf16 %v743_v32, %v740_v29  ;;  %v745_v36 = vpop.f32.mrb[15].mxu1  ;;  %v4610_v32 = vld [vmem:[%s5708_s3 + $0x90] sm:$0xff]  }
 0x1fb   : > { %v1011_v43 = vpop.f32.mrb[16].mxu1 }
 0x1fc   : > { %v1013_v44 = vpop.f32.mrb[17].mxu1 }
 0x1fd   : > { %v1014_v45 = vpop.f32.mrb[18].mxu1 }
 0x1fe   : > { %v1067_v48 = vpack.c.bf16 %v1014_v45, %v1011_v43  ;;  %v1016_v49 = vpop.f32.mrb[19].mxu1  ;;  %v4598_v43 = vld [vmem:[%s5706_s1 + $0xf8] ss:$8 sps:$4 sm:$0xff]   ;;  %v4603_v45 = vld [vmem:[%s5706_s1 + $0x10c] ss:$8 sps:$4 sm:$0xff]  }
 0x200   : > { %4214 = vmatprep.subr.bf16.mxu0 %v1067_v48 }
 0x201   : > { %4215 = vmatpush3.bf16.msra.mxu0 %v1067_v48  ;;  %v3978_v48 = vcombine.high %v3968_v42, %v3968_v42 }
 0x203   : > { %v1019_v50 = vpop.f32.mrb[20].mxu1 }
 0x204   : > { %v1021_v51 = vpop.f32.mrb[21].mxu1 }
 0x205   : > { %v1022_v52 = vpop.f32.mrb[22].mxu1 }
 0x206   : > { %v1068_v53 = vpack.c.bf16 %v1022_v52, %v1019_v50  ;;  %v1024_v54 = vpop.f32.mrb[23].mxu1  ;;  %v4601_v52 = vld [vmem:[%s5706_s1 + $0x108] ss:$8 sps:$4 sm:$0xff]  }
 0x208   : > { %4216 = vmatprep.subr.bf16.mxu0 %v1068_v53 }
 0x209   : > { %4217 = vmatpush3.bf16.msra.mxu0 %v1068_v53 }
 0x20b   : > { %v1027_v55 = vpop.f32.mrb[24].mxu1 }
 0x20c   : > { %v1029_v56 = vpop.f32.mrb[25].mxu1 }
 0x20d   : > { %v1030_v57 = vpop.f32.mrb[26].mxu1 }
 0x20e   : > { %v1069_v58 = vpack.c.bf16 %v1030_v57, %v1027_v55  ;;  %v1032_v59 = vpop.f32.mrb[27].mxu1  ;;  %v3977_v55 = vcombine.low %v3968_v42, %v3968_v42  ;;  %v2126_v57 = vand.u32 %v3978_v48, %v4799_v10  ;;  %v4626_v42 = vld [vmem:[%s5708_s3 + $0x50] sm:$0xff]  }
 0x210   : > { %4218 = vmatprep.subr.bf16.mxu0 %v1069_v58 }
 0x211   : > { %4219 = vmatpush3.bf16.msra.mxu0 %v1069_v58 }
 0x213   : > { %v1035_v60 = vpop.f32.mrb[28].mxu1 }
 0x214   : > { %v1037_v61 = vpop.f32.mrb[29].mxu1 }
 0x215   : > { %v1038_v62 = vpop.f32.mrb[30].mxu1 }
 0x216   : > { %v1070_v63 = vpack.c.bf16 %v1038_v62, %v1035_v60  ;;  %v1040_v0 = vpop.f32.mrb[31].mxu1  ;;  %v4611_v60 = vld [vmem:[%s5708_s3 + $0x98] sm:$0xff]  }
 0x217   : > { %v4612_v0 = vld [vmem:[%s5708_s3 + $0xa0] sm:$0xff]  }
 0x218   : > { %4220 = vmatprep.subr.bf16.mxu0 %v1070_v63 }
 0x219   : > { %4221 = vmatpush3.bf16.msra.mxu0 %v1070_v63 }
 0x21a   : > { %4246 = vmatprep.subr.bf16.mxu0 %v771_v27 }
 0x21b   : > { %v1617_v4 = vpop.f32.mrb[32].mxu1 }
 0x21c   : > { %v1672_v5 = vmul.f32 0.01, %v1617_v4  ;;  %v1619_v6 = vpop.f32.mrb[33].mxu1  ;;  %4223 = vmatmul.mubr.msk.bf16.vlgmr.msra.gmra.mrb[32].mxu0 %vm1131_vm9, %v4591_v1  ;;  %vm1656_vm10 = vcmp.ge.f32.partialorder %v1617_v4, 0.0 }
 0x21d   : > { %v1673_v7 = vmul.f32 0.01, %v1619_v6  ;;  %4247 = vmatpush3.bf16.msra.mxu0 %v771_v27  ;;  %v1621_v8 = vpop.f32.mrb[34].mxu1  ;;  %4226 = vmatprep.mubr.msk.bf16.mxu0 %vm1131_vm9, %v4606_v3  ;;  %vm1657_vm11 = vcmp.ge.f32.partialorder %v1619_v6, 0.0  ;;  %v2123_v3 = vand.u32 %v3977_v55, %v4799_v10 }
 0x21e   : > { %vm1658_vm12 = vcmp.ge.f32.partialorder %v1621_v8, 0.0  ;;  %v1674_v9 = vmul.f32 0.01, %v1621_v8  ;;  %4248 = vmatprep.subr.bf16.mxu0 %v5066_v38  ;;  %v1623_v11 = vpop.f32.mrb[35].mxu1  ;;  %v1688_v13 = vsel %vm1656_vm10, %v1617_v4, %v1672_v5 }
 0x21f   : > { %vm1659_vm13 = vcmp.ge.f32.partialorder %v1623_v11, 0.0  ;;  %v1675_v12 = vmul.f32 0.01, %v1623_v11  ;;  %v1689_v19 = vsel %vm1657_vm11, %v1619_v6, %v1673_v7 }
 0x220   : > { %v1690_v14 = vsel %vm1658_vm12, %v1621_v8, %v1674_v9 }
 0x221   : > { %v1704_v20 = vpack.c.bf16 %v1690_v14, %v1688_v13  ;;  %v1691_v21 = vsel %vm1659_vm13, %v1623_v11, %v1675_v12  ;;  %4249 = vmatpush3.bf16.msra.mxu0 %v5066_v38  ;;  %v4613_v14 = vld [vmem:[%s5708_s3 + $0xa8] sm:$0xff]  }
 0x222   : > { %v1705_v23 = vpack.c.bf16 %v1691_v21, %v1689_v19  ;;  %4250 = vmatprep.subr.bf16.mxu0 %v5068_v26  ;;  %v4614_v21 = vld [vmem:[%s5708_s3 + $0xb0] sm:$0xff]  }
 0x223   : > { %v1627_v16 = vpop.f32.mrb[36].mxu1 }
 0x224   : > { %v1676_v22 = vmul.f32 0.01, %v1627_v16  ;;  %v1629_v24 = vpop.f32.mrb[37].mxu1  ;;  %3908 = vmatprep.mubr.msk.bf16.mxu1 %vm662_vm8, %v1705_v23  ;;  %4227 = vmatmul.mubr.msk.bf16.gmra.mrb[36].mxu0 %vm1131_vm9, %v4607_v15  ;;  %vm1660_vm14 = vcmp.ge.f32.partialorder %v1627_v16, 0.0 }
 0x225   : > { %v1677_v27 = vmul.f32 0.01, %v1629_v24  ;;  %4251 = vmatpush3.bf16.msra.mxu0 %v5068_v26  ;;  %v1631_v30 = vpop.f32.mrb[38].mxu1  ;;  %1757 = vmatmul.mubr.bf16.vlgmr.msra.gmra.mrb[48].mxu1 %v1704_v20  ;;  %vm1661_vm15 = vcmp.ge.f32.partialorder %v1629_v24, 0.0  ;;  %v4609_v26 = vld [vmem:[%s5708_s3 + $0x88] sm:$0xff]  }
 0x226   : > { %vm1662_vm0 = vcmp.ge.f32.partialorder %v1631_v30, 0.0  ;;  %v1678_v35 = vmul.f32 0.01, %v1631_v30  ;;  %4252 = vmatprep.subr.bf16.mxu0 %v5070_v34  ;;  %v1633_v37 = vpop.f32.mrb[39].mxu1  ;;  %2129 = vmatpush1.bf16.msra.mxu1 %v4592_v25  ;;  %v1692_v40 = vsel %vm1660_vm14, %v1627_v16, %v1676_v22  ;;  %v4615_v25 = vld [vmem:[%s5708_s3 + $0xb8] sm:$0xff]   ;;  %v4616_v16 = vld [vmem:[%s5708_s3] sm:$0xff]  }
 0x227   : > { %vm1663_vm2 = vcmp.ge.f32.partialorder %v1633_v37, 0.0  ;;  %v1679_v38 = vmul.f32 0.01, %v1633_v37  ;;  %2130 = vmatprep.subr.bf16.mxu1 %v4597_v17  ;;  %4230 = vmatprep.mubr.msk.bf16.mxu0 %vm1131_vm9, %v4608_v18  ;;  %v1693_v28 = vsel %vm1661_vm15, %v1629_v24, %v1677_v27  ;;  %v4678_v17 = vld [vmem:[%s4793_s29] sm:$0xff]   ;;  %v4617_v18 = vld [vmem:[%s5708_s3 + $0x8] sm:$0xff]   ;;  %v4618_v22 = vld [vmem:[%s5708_s3 + $0x10] sm:$0xff]  }
 0x228   : > { %v1694_v41 = vsel %vm1662_vm0, %v1631_v30, %v1678_v35  ;;  %v4679_v24 = vld [vmem:[%s4793_s29 + $0x8] sm:$0xff]   ;;  %v4619_v27 = vld [vmem:[%s5708_s3 + $0x18] sm:$0xff]   ;;  %v4620_v30 = vld [vmem:[%s5708_s3 + $0x20] sm:$0xff]  }
 0x229   : > { %v1695_v29 = vsel %vm1663_vm2, %v1633_v37, %v1679_v38  ;;  %4253 = vmatpush3.bf16.msra.mxu0 %v5070_v34  ;;  %v1706_v31 = vpack.c.bf16 %v1694_v41, %v1692_v40  ;;  %v4681_v35 = vld [vmem:[%s4793_s29 + $0x18] sm:$0xff]   ;;  %v4621_v37 = vld [vmem:[%s5708_s3 + $0x28] sm:$0xff]   ;;  %v4622_v38 = vld [vmem:[%s5708_s3 + $0x30] sm:$0xff]  }
 0x22a   : > { %v1707_v36 = vpack.c.bf16 %v1695_v29, %v1693_v28  ;;  %2131 = vmatpush1.bf16.msra.mxu1 %v4595_v33  ;;  %v4680_v33 = vld [vmem:[%s4793_s29 + $0x10] sm:$0xff]   ;;  %v4624_v40 = vld [vmem:[%s5708_s3 + $0x40] sm:$0xff]   ;;  %v4625_v41 = vld [vmem:[%s5708_s3 + $0x48] sm:$0xff]  }
 0x22b   : > { %v1637_v44 = vpop.f32.mrb[40].mxu1  ;;  %2132 = vmatprep.subr.bf16.mxu1 %v4600_v39  ;;  %v4623_v39 = vld [vmem:[%s5708_s3 + $0x38] sm:$0xff]   ;;  %v4628_v28 = vld [vmem:[%s5708_s3 + $0xc0] sm:$0xff]  }
 0x22c   : > { %v1680_v49 = vmul.f32 0.01, %v1637_v44  ;;  %v1639_v34 = vpop.f32.mrb[41].mxu1  ;;  %3909 = vmatprep.mubr.msk.bf16.mxu1 %vm662_vm8, %v1707_v36  ;;  %4231 = vmatmul.mubr.msk.bf16.gmra.mrb[40].mxu0 %vm1131_vm9, %v4609_v26  ;;  %vm1664_vm3 = vcmp.ge.f32.partialorder %v1637_v44, 0.0  ;;  %v4627_v26 = vld [vmem:[%s5708_s3 + $0x58] sm:$0xff]  }
 0x22d   : > { %v1681_v50 = vmul.f32 0.01, %v1639_v34  ;;  %v1641_v51 = vpop.f32.mrb[42].mxu1  ;;  %1765 = vmatmul.mubr.bf16.gmra.mrb[52].mxu1 %v1706_v31  ;;  %4234 = vmatprep.mubr.msk.bf16.mxu0 %vm1131_vm9, %v4610_v32  ;;  %vm1665_vm4 = vcmp.ge.f32.partialorder %v1639_v34, 0.0 }
 0x22e   : > { %vm1666_vm5 = vcmp.ge.f32.partialorder %v1641_v51, 0.0  ;;  %v1682_v53 = vmul.f32 0.01, %v1641_v51  ;;  %v1643_v54 = vpop.f32.mrb[43].mxu1  ;;  %2133 = vmatpush1.bf16.msra.mxu1 %v4598_v43  ;;  %v1696_v58 = vsel %vm1664_vm3, %v1637_v44, %v1680_v49 }
 0x22f   : > { %vm1667_vm6 = vcmp.ge.f32.partialorder %v1643_v54, 0.0  ;;  %v1683_v56 = vmul.f32 0.01, %v1643_v54  ;;  %2134 = vmatprep.subr.bf16.mxu1 %v4603_v45  ;;  %v1697_v61 = vsel %vm1665_vm4, %v1639_v34, %v1681_v50 }
 0x230   : > { %v1698_v59 = vsel %vm1666_vm5, %v1641_v51, %v1682_v53 }
 0x231   : > { %v1699_v62 = vsel %vm1667_vm6, %v1643_v54, %v1683_v56  ;;  %v1708_v63 = vpack.c.bf16 %v1698_v59, %v1696_v58 }
 0x232   : > { %v1709_v1 = vpack.c.bf16 %v1699_v62, %v1697_v61  ;;  %2135 = vmatpush1.bf16.msra.mxu1 %v4601_v52  ;;  %v4630_v61 = vld [vmem:[%s5708_s3 + $0xd0] sm:$0xff]  }
 0x233   : > { %v1647_v4 = vpop.f32.mrb[44].mxu1  ;;  %2136 = vmatprep.subr.bf16.mxu1 %v2126_v57 }
 0x234   : > { %v1684_v5 = vmul.f32 0.01, %v1647_v4  ;;  %v1649_v6 = vpop.f32.mrb[45].mxu1  ;;  %3910 = vmatprep.mubr.msk.bf16.mxu1 %vm662_vm8, %v1709_v1  ;;  %4235 = vmatmul.mubr.msk.bf16.gmra.mrb[44].mxu0 %vm1131_vm9, %v4611_v60  ;;  %vm1668_vm7 = vcmp.ge.f32.partialorder %v1647_v4, 0.0  ;;  %v4629_v60 = vld [vmem:[%s5708_s3 + $0xc8] sm:$0xff]   ;;  %v4682_v1 = vld [vmem:[%s5707_s2] sm:$0xff]  }
 0x235   : > { %v1685_v7 = vmul.f32 0.01, %v1649_v6  ;;  %v1651_v8 = vpop.f32.mrb[46].mxu1  ;;  %1773 = vmatmul.mubr.bf16.gmra.mrb[56].mxu1 %v1708_v63  ;;  %4238 = vmatprep.mubr.msk.bf16.mxu0 %vm1131_vm9, %v4612_v0  ;;  %vm1669_vm10 = vcmp.ge.f32.partialorder %v1649_v6, 0.0 }
 0x236   : > { %vm1670_vm11 = vcmp.ge.f32.partialorder %v1651_v8, 0.0  ;;  %v1686_v9 = vmul.f32 0.01, %v1651_v8  ;;  %v1653_v11 = vpop.f32.mrb[47].mxu1  ;;  %2137 = vmatpush1.bf16.msra.mxu1 %v2123_v3  ;;  %v1700_v12 = vsel %vm1668_vm7, %v1647_v4, %v1684_v5 }
 0x237   : > { %vm1671_vm12 = vcmp.ge.f32.partialorder %v1653_v11, 0.0  ;;  %v1687_v10 = vmul.f32 0.01, %v1653_v11  ;;  %v1701_v15 = vsel %vm1669_vm10, %v1649_v6, %v1685_v7 }
 0x238   : > { %v1702_v13 = vsel %vm1670_vm11, %v1651_v8, %v1686_v9 }
 0x239   : > { %v1703_v19 = vsel %vm1671_vm12, %v1653_v11, %v1687_v10  ;;  %v1710_v20 = vpack.c.bf16 %v1702_v13, %v1700_v12  ;;  %v4631_v11 = vld [vmem:[%s5708_s3 + $0xd8] sm:$0xff]   ;;  %v4683_v12 = vld [vmem:[%s5707_s2 + $0x8] sm:$0xff]   ;;  %v4632_v13 = vld [vmem:[%s5708_s3 + $0xe0] sm:$0xff]  }
 0x23a   : > { %v1711_v23 = vpack.c.bf16 %v1703_v19, %v1701_v15 }
 0x23c   : > { %3911 = vmatprep.mubr.msk.bf16.mxu1 %vm662_vm8, %v1711_v23  ;;  %4239 = vmatmul.mubr.msk.bf16.gmra.mrb[48].mxu0 %vm1131_vm9, %v4613_v14 }
 0x23d   : > { %1781 = vmatmul.mubr.bf16.gmra.mrb[60].mxu1 %v1710_v20  ;;  %4242 = vmatprep.mubr.msk.bf16.mxu0 %vm1131_vm9, %v4614_v21 }
 0x23e   : > { %2160 = vmatprep.mubr.bf16.mxu1 %v4701_v2 }
 0x244   : > { %4243 = vmatmul.mubr.msk.bf16.gmra.mrb[52].mxu0 %vm1131_vm9, %v4615_v25  ;;  %v4684_v25 = vld [vmem:[%s5707_s2 + $0x10] sm:$0xff]  }
 0x245   : > { %3979 = vmatmul.mubr.msk.bf16.vlgmr.msra.gmra.mrb[64].mxu1 %vm419_vm1, %v4678_v17  ;;  %4254 = vmatprep.mubr.msk.bf16.mxu0 %vm1131_vm9, %v4616_v16 }
 0x246   : > { %2170 = vmatprep.mubr.bf16.mxu1 %v4701_v2 }
 0x24c   : > { %4255 = vmatmul.mubr.msk.bf16.vlgmr.msra.gmra.mrb[32].mxu0 %vm1131_vm9, %v4617_v18 }
 0x24d   : > { %3980 = vmatmul.mubr.msk.bf16.gmra.mrb[68].mxu1 %vm419_vm1, %v4679_v24  ;;  %4258 = vmatprep.mubr.msk.bf16.mxu0 %vm1131_vm9, %v4618_v22 }
 0x24e   : > { %2180 = vmatprep.mubr.bf16.mxu1 %v4701_v2 }
 0x254   : > { %4259 = vmatmul.mubr.msk.bf16.gmra.mrb[36].mxu0 %vm1131_vm9, %v4619_v27 }
 0x255   : > { %3981 = vmatmul.mubr.msk.bf16.gmra.mrb[72].mxu1 %vm419_vm1, %v4680_v33  ;;  %4262 = vmatprep.mubr.msk.bf16.mxu0 %vm1131_vm9, %v4620_v30  ;;  %v4633_v33 = vld [vmem:[%s5708_s3 + $0xe8] sm:$0xff]  }
 0x256   : > { %2190 = vmatprep.mubr.bf16.mxu1 %v4701_v2 }
 0x25c   : > { %4263 = vmatmul.mubr.msk.bf16.gmra.mrb[40].mxu0 %vm1131_vm9, %v4621_v37  ;;  %v4685_v37 = vld [vmem:[%s5707_s2 + $0x18] sm:$0xff]  }
 0x25d   : > { %3982 = vmatmul.mubr.msk.bf16.gmra.mrb[76].mxu1 %vm419_vm1, %v4681_v35  ;;  %4266 = vmatprep.mubr.msk.bf16.mxu0 %vm1131_vm9, %v4622_v38  ;;  %v4634_v38 = vld [vmem:[%s5708_s3 + $0xf0] sm:$0xff]  }
 0x264   : > { %4267 = vmatmul.mubr.msk.bf16.gmra.mrb[44].mxu0 %vm1131_vm9, %v4623_v39 }
 0x265   : > { %4270 = vmatprep.mubr.msk.bf16.mxu0 %vm1131_vm9, %v4624_v40 }
 0x26c   : > { %4271 = vmatmul.mubr.msk.bf16.gmra.mrb[48].mxu0 %vm1131_vm9, %v4625_v41 }
 0x26d   : > { %4274 = vmatprep.mubr.msk.bf16.mxu0 %vm1131_vm9, %v4626_v42 }
 0x274   : > { %4275 = vmatmul.mubr.msk.bf16.gmra.mrb[52].mxu0 %vm1131_vm9, %v4627_v26 }
 0x275   : > { %4286 = vmatprep.mubr.msk.bf16.mxu0 %vm1131_vm9, %v4628_v28 }
 0x2f8   : > { %v1758_v29 = vpop.f32.mrb[48].mxu1 }
 0x2f9   : > { %v1760_v31 = vpop.f32.mrb[49].mxu1 }
 0x2fa   : > { %v1761_v32 = vpop.f32.mrb[50].mxu1 }
 0x2fb   : > { %v1814_v36 = vpack.c.bf16 %v1761_v32, %v1758_v29  ;;  %v1763_v43 = vpop.f32.mrb[51].mxu1  ;;  %v4686_v29 = vld [vmem:[%s5707_s2 + $0x20] sm:$0xff]  }
 0x2fd   : > { %4278 = vmatprep.subr.bf16.mxu0 %v1814_v36 }
 0x2fe   : > { %4279 = vmatpush3.bf16.msra.mxu0 %v1814_v36 }
 0x300   : > { %v1766_v44 = vpop.f32.mrb[52].mxu1 }
 0x301   : > { %v1768_v45 = vpop.f32.mrb[53].mxu1 }
 0x302   : > { %v1769_v48 = vpop.f32.mrb[54].mxu1 }
 0x303   : > { %v1815_v49 = vpack.c.bf16 %v1769_v48, %v1766_v44  ;;  %v1771_v34 = vpop.f32.mrb[55].mxu1 }
 0x305   : > { %4280 = vmatprep.subr.bf16.mxu0 %v1815_v49 }
 0x306   : > { %4281 = vmatpush3.bf16.msra.mxu0 %v1815_v49  ;;  %v4635_v49 = vld [vmem:[%s5708_s3 + $0xf8] sm:$0xff]  }
 0x308   : > { %v1774_v50 = vpop.f32.mrb[56].mxu1 }
 0x309   : > { %v1776_v51 = vpop.f32.mrb[57].mxu1 }
 0x30a   : > { %v1777_v52 = vpop.f32.mrb[58].mxu1  ;;  %v4636_v51 = vld [vmem:[%s5708_s3 + $0x100] sm:$0xff]  }
 0x30b   : > { %v1816_v53 = vpack.c.bf16 %v1777_v52, %v1774_v50  ;;  %v1779_v54 = vpop.f32.mrb[59].mxu1  ;;  %v4687_v50 = vld [vmem:[%s5707_s2 + $0x28] sm:$0xff]  }
 0x30d   : > { %4282 = vmatprep.subr.bf16.mxu0 %v1816_v53 }
 0x30e   : > { %4283 = vmatpush3.bf16.msra.mxu0 %v1816_v53 }
 0x310   : > { %v1782_v55 = vpop.f32.mrb[60].mxu1 }
 0x311   : > { %v1784_v56 = vpop.f32.mrb[61].mxu1 }
 0x312   : > { %v1785_v57 = vpop.f32.mrb[62].mxu1 }
 0x313   : > { %v1817_v58 = vpack.c.bf16 %v1785_v57, %v1782_v55  ;;  %v1787_v59 = vpop.f32.mrb[63].mxu1 }
 0x315   : > { %4284 = vmatprep.subr.bf16.mxu0 %v1817_v58 }
 0x316   : > { %4285 = vmatpush3.bf16.msra.mxu0 %v1817_v58  ;;  %v4688_v58 = vld [vmem:[%s5707_s2 + $0x30] sm:$0xff]  }
 0x317   : > { %2269 = vmatprep.subr.bf16.mxu0 %v4701_v2 }
 0x318   : > { %v2162_v62 = vpop.f32.mrb[64].mxu1 }
 0x319   : > { %4287 = vmatmul.mubr.msk.bf16.vlgmr.msra.gmra.mrb[32].mxu0 %vm1131_vm9, %v4629_v60  ;;  %vm2201_vm1 = vcmp.ge.f32.partialorder %v2162_v62, 0.0  ;;  %v2217_v63 = vmul.f32 0.01, %v2162_v62  ;;  %v2164_v0 = vpop.f32.mrb[65].mxu1 }
 0x31a   : > { %2270 = vmatpush1.bf16.msra.mxu0 %v4682_v1  ;;  %4290 = vmatprep.mubr.msk.bf16.mxu0 %vm1131_vm9, %v4630_v61  ;;  %vm2202_vm13 = vcmp.ge.f32.partialorder %v2164_v0, 0.0  ;;  %v2218_v3 = vmul.f32 0.01, %v2164_v0  ;;  %v2166_v4 = vpop.f32.mrb[66].mxu1 }
 0x31b   : > { %2271 = vmatprep.subr.bf16.mxu0 %v4701_v2  ;;  %v5231_v5 = vsel %vm2201_vm1, %v2162_v62, %v2217_v63  ;;  %vm2203_vm14 = vcmp.ge.f32.partialorder %v2166_v4, 0.0  ;;  %v2219_v6 = vmul.f32 0.01, %v2166_v4  ;;  %v2168_v7 = vpop.f32.mrb[67].mxu1 }
 0x31c   : > { %v5233_v8 = vsel %vm2202_vm13, %v2164_v0, %v2218_v3  ;;  %vm2204_vm15 = vcmp.ge.f32.partialorder %v2168_v7, 0.0  ;;  %v2220_v9 = vmul.f32 0.01, %v2168_v7  ;;  %v4637_v3 = vld [vmem:[%s5708_s3 + $0x108] sm:$0xff]  }
 0x31d   : > { %v5238_v10 = vsel %vm2203_vm14, %v2166_v4, %v2219_v6  ;;  %v4689_v6 = vld [vmem:[%s5707_s2 + $0x38] sm:$0xff]  }
 0x31e   : > { %2272 = vmatpush1.bf16.msra.mxu0 %v4683_v12  ;;  %v2249_v14 = vpack.c.bf16 %v5238_v10, %v5231_v5  ;;  %v5248_v15 = vsel %vm2204_vm15, %v2168_v7, %v2220_v9  ;;  %v4638_v7 = vld [vmem:[%s5708_s3 + $0x110] sm:$0xff]   ;;  %v2615_v5 = vld [vmem:[%s5709_s4 + $0x18] sm:$0xff]  ;;  %v2613_v10 = vld [vmem:[%s5709_s4 + $0x8] sm:$0xff] }
 0x31f   : > { %2273 = vmatprep.subr.bf16.mxu0 %v4701_v2  ;;  %v2250_v19 = vpack.c.bf16 %v5248_v15, %v5233_v8  ;;  %v2612_v8 = vld [vmem:[%s5709_s4] sm:$0xff]  ;;  %v2617_v15 = vld [vmem:[%s5709_s4 + $0x28] sm:$0xff] }
 0x320   : > { %v2172_v20 = vpop.f32.mrb[68].mxu1  ;;  %2638 = vperm.xlu1 %4531, %v2612_v8  }
 0x321   : > { %4291 = vmatmul.mubr.msk.bf16.gmra.mrb[36].mxu0 %vm1131_vm9, %v4631_v11  ;;  %vm2205_vm0 = vcmp.ge.f32.partialorder %v2172_v20, 0.0  ;;  %v2221_v21 = vmul.f32 0.01, %v2172_v20  ;;  %v2174_v23 = vpop.f32.mrb[69].mxu1 }
 0x322   : > { %2274 = vmatpush1.bf16.msra.mxu0 %v4684_v25  ;;  %4294 = vmatprep.mubr.msk.bf16.mxu0 %vm1131_vm9, %v4632_v13  ;;  %vm2206_vm2 = vcmp.ge.f32.partialorder %v2174_v23, 0.0  ;;  %v2222_v16 = vmul.f32 0.01, %v2174_v23  ;;  %v2176_v17 = vpop.f32.mrb[70].mxu1  ;;  %v4690_v13 = vld [vmem:[%s5707_s2 + $0x40] sm:$0xff]   ;;  %v2619_v25 = vld [vmem:[%s5709_s4 + $0x38] sm:$0xff] }
 0x323   : > { %2275 = vmatprep.subr.bf16.mxu0 %v4701_v2  ;;  %v5259_v18 = vsel %vm2205_vm0, %v2172_v20, %v2221_v21  ;;  %vm2207_vm3 = vcmp.ge.f32.partialorder %v2176_v17, 0.0  ;;  %v2223_v22 = vmul.f32 0.01, %v2176_v17  ;;  %v2178_v24 = vpop.f32.mrb[71].mxu1  ;;  %v4639_v20 = vld [vmem:[%s5708_s3 + $0x118] sm:$0xff]   ;;  %v4691_v21 = vld [vmem:[%s5707_s2 + $0x48] sm:$0xff]  }
 0x324   : > { %v5261_v27 = vsel %vm2206_vm2, %v2174_v23, %v2222_v16  ;;  %vm2208_vm4 = vcmp.ge.f32.partialorder %v2178_v24, 0.0  ;;  %v2224_v30 = vmul.f32 0.01, %v2178_v24  ;;  %v4692_v23 = vld [vmem:[%s5707_s2 + $0x50] sm:$0xff]   ;;  %2643 = vperm.xlu1 %4531, %v2613_v10   ;;  %v2620_v16 = vld [vmem:[%s5709_s4 + $0x40] sm:$0xff]  ;;  %vm2880_vm2 = vcmask 171008  }
 0x325   : > { %v5266_v35 = vsel %vm2207_vm3, %v2176_v17, %v2223_v22  ;;  %v2621_v17 = vld [vmem:[%s5709_s4 + $0x48] sm:$0xff]  ;;  %v2623_v22 = vld [vmem:[%s5709_s4 + $0x58] sm:$0xff] }
 0x326   : > { %2276 = vmatpush1.bf16.msra.mxu0 %v4685_v37  ;;  %v5274_v39 = vsel %vm2208_vm4, %v2178_v24, %v2224_v30  ;;  %v2251_v40 = vpack.c.bf16 %v5266_v35, %v5259_v18  ;;  %v2622_v18 = vld [vmem:[%s5709_s4 + $0x50] sm:$0xff]  ;;  %v4703_v24 = vmov 0.0   ;;  %v2627_v37 = vld [vmem:[%s5709_s4 + $0x78] sm:$0xff] }
 0x327   : > { %2277 = vmatprep.subr.bf16.mxu0 %v4701_v2  ;;  %v2252_v41 = vpack.c.bf16 %v5274_v39, %v5261_v27  ;;  %4342 = vmatprep.subr.bf16.mxu1 %v4703_v24  ;;  %v2624_v27 = vld [vmem:[%s5709_s4 + $0x60] sm:$0xff]  ;;  %v4652_v30 = vld [vmem:[%s5710_s5 + $0xc] sm:$0xff]  }
 0x328   : > { %v2182_v42 = vpop.f32.mrb[72].mxu1  ;;  %2663 = vperm.xlu1 %4531, %v2617_v15   ;;  %v2626_v35 = vld [vmem:[%s5709_s4 + $0x70] sm:$0xff]  ;;  %4343 = vmatpush3.bf16.msra.mxu1 %v4652_v30  ;;  %v2629_v39 = vld [vmem:[%s5709_s4 + $0x88] sm:$0xff] }
 0x329   : > { %4295 = vmatmul.mubr.msk.bf16.gmra.mrb[40].mxu0 %vm1131_vm9, %v4633_v33  ;;  %vm2209_vm5 = vcmp.ge.f32.partialorder %v2182_v42, 0.0  ;;  %v2225_v26 = vmul.f32 0.01, %v2182_v42  ;;  %v2184_v28 = vpop.f32.mrb[73].mxu1  ;;  %v2625_v33 = vld [vmem:[%s5709_s4 + $0x68] sm:$0xff]  ;;  %4344 = vmatprep.subr.bf16.mxu1 %v4703_v24 }
 0x32a   : > { %2278 = vmatpush1.bf16.msra.mxu0 %v4686_v29  ;;  %4298 = vmatprep.mubr.msk.bf16.mxu0 %vm1131_vm9, %v4634_v38  ;;  %vm2210_vm6 = vcmp.ge.f32.partialorder %v2184_v28, 0.0  ;;  %v2226_v31 = vmul.f32 0.01, %v2184_v28  ;;  %v2186_v32 = vpop.f32.mrb[74].mxu1  ;;  %v2628_v38 = vld [vmem:[%s5709_s4 + $0x80] sm:$0xff]  ;;  %v2635_v29 = vld [vmem:[%s5709_s4 + $0xb8] sm:$0xff] }
 0x32b   : > { %2279 = vmatprep.subr.bf16.mxu0 %v4701_v2  ;;  %v5287_v36 = vsel %vm2209_vm5, %v2182_v42, %v2225_v26  ;;  %vm2211_vm7 = vcmp.ge.f32.partialorder %v2186_v32, 0.0  ;;  %v2227_v43 = vmul.f32 0.01, %v2186_v32  ;;  %v2188_v44 = vpop.f32.mrb[75].mxu1  ;;  %v2632_v42 = vld [vmem:[%s5709_s4 + $0xa0] sm:$0xff]  ;;  %v2633_v26 = vld [vmem:[%s5709_s4 + $0xa8] sm:$0xff] }
 0x32c   : > { %v2242_v45 = vsel %vm2210_vm6, %v2184_v28, %v2226_v31  ;;  %vm2212_vm10 = vcmp.ge.f32.partialorder %v2188_v44, 0.0  ;;  %v2228_v48 = vmul.f32 0.01, %v2188_v44  ;;  %2673 = vperm.xlu1 %4531, %v2619_v25   ;;  %v2634_v28 = vld [vmem:[%s5709_s4 + $0xb0] sm:$0xff] }
 0x32d   : > { %v2243_v34 = vsel %vm2211_vm7, %v2186_v32, %v2227_v43 }
 0x32e   : > { %2280 = vmatpush1.bf16.msra.mxu0 %v4687_v50  ;;  %v2244_v52 = vsel %vm2212_vm10, %v2188_v44, %v2228_v48  ;;  %v2253_v53 = vpack.c.bf16 %v2243_v34, %v5287_v36 }
 0x32f   : > { %2281 = vmatprep.subr.bf16.mxu0 %v4701_v2  ;;  %v2254_v54 = vpack.c.bf16 %v2244_v52, %v2242_v45 }
 0x330   : > { %v2192_v55 = vpop.f32.mrb[76].mxu1  ;;  %2683 = vperm.xlu1 %4531, %v2621_v17  }
 0x331   : > { %4299 = vmatmul.mubr.msk.bf16.gmra.mrb[44].mxu0 %vm1131_vm9, %v4635_v49  ;;  %vm2213_vm11 = vcmp.ge.f32.partialorder %v2192_v55, 0.0  ;;  %v2229_v56 = vmul.f32 0.01, %v2192_v55  ;;  %v2194_v57 = vpop.f32.mrb[77].mxu1 }
 0x332   : > { %2282 = vmatpush1.bf16.msra.mxu0 %v4688_v58  ;;  %4302 = vmatprep.mubr.msk.bf16.mxu0 %vm1131_vm9, %v4636_v51  ;;  %vm2214_vm12 = vcmp.ge.f32.partialorder %v2194_v57, 0.0  ;;  %v2230_v59 = vmul.f32 0.01, %v2194_v57  ;;  %v2196_v60 = vpop.f32.mrb[78].mxu1 }
 0x333   : > { %2283 = vmatprep.subr.bf16.mxu0 %v4701_v2  ;;  %v2245_v61 = vsel %vm2213_vm11, %v2192_v55, %v2229_v56  ;;  %vm2215_vm1 = vcmp.ge.f32.partialorder %v2196_v60, 0.0  ;;  %v2231_v62 = vmul.f32 0.01, %v2196_v60  ;;  %v2198_v63 = vpop.f32.mrb[79].mxu1 }
 0x334   : > { %v2246_v0 = vsel %vm2214_vm12, %v2194_v57, %v2230_v59  ;;  %vm2216_vm13 = vcmp.ge.f32.partialorder %v2198_v63, 0.0  ;;  %v2232_v1 = vmul.f32 0.01, %v2198_v63  ;;  %2693 = vperm.xlu1 %4531, %v2623_v22  }
 0x335   : > { %v2247_v4 = vsel %vm2215_vm1, %v2196_v60, %v2231_v62  ;;  %v4642_v62 = vld [vmem:[%s5708_s3 + $0x130] sm:$0xff]  }
 0x336   : > { %2284 = vmatpush1.bf16.msra.mxu0 %v4689_v6  ;;  %v2248_v9 = vsel %vm2216_vm13, %v2198_v63, %v2232_v1  ;;  %v2255_v11 = vpack.c.bf16 %v2247_v4, %v2245_v61  ;;  %v4641_v61 = vld [vmem:[%s5708_s3 + $0x128] sm:$0xff]   ;;  %v4643_v63 = vld [vmem:[%s5708_s3 + $0x138] sm:$0xff]   ;;  %v4648_v6 = vld [vmem:[%s5708_s3 + $0x160] sm:$0xff]  }
 0x337   : > { %2285 = vmatprep.subr.bf16.mxu0 %v4701_v2  ;;  %v2256_v12 = vpack.c.bf16 %v2248_v9, %v2246_v0  ;;  %v4644_v0 = vld [vmem:[%s5708_s3 + $0x140] sm:$0xff]   ;;  %v4645_v1 = vld [vmem:[%s5708_s3 + $0x148] sm:$0xff]   ;;  %v4647_v4 = vld [vmem:[%s5708_s3 + $0x158] sm:$0xff]  }
 0x338   : > { %2703 = vperm.xlu1 %4531, %v2625_v33   ;;  %v4650_v9 = vld [vmem:[%s5708_s3 + $0x170] sm:$0xff]  }
 0x339   : > { %4303 = vmatmul.mubr.msk.bf16.gmra.mrb[48].mxu0 %vm1131_vm9, %v4637_v3  ;;  %v4646_v3 = vld [vmem:[%s5708_s3 + $0x150] sm:$0xff]  }
 0x33a   : > { %2286 = vmatpush1.bf16.msra.mxu0 %v4690_v13  ;;  %4306 = vmatprep.mubr.msk.bf16.mxu0 %vm1131_vm9, %v4638_v7  ;;  %v4649_v7 = vld [vmem:[%s5708_s3 + $0x168] sm:$0xff]  }
 0x33b   : > { %2287 = vmatprep.subr.bf16.mxu0 %v4701_v2 }
 0x33c   : > { %2713 = vperm.xlu1 %4531, %v2627_v37  }
 0x33e   : > { %2288 = vmatpush1.bf16.msra.mxu0 %v4691_v21  ;;  %v4663_v21 = vld [vmem:[%s5710_s5 + $0x74] ss:$0 sps:$4 sm:$0x77]  }
 0x33f   : > { %2289 = vmatprep.subr.bf16.mxu0 %v4701_v2 }
 0x340   : > { %2723 = vperm.xlu1 %4531, %v2629_v39  }
 0x341   : > { %4307 = vmatmul.mubr.msk.bf16.gmra.mrb[52].mxu0 %vm1131_vm9, %v4639_v20  ;;  %v4661_v20 = vld [vmem:[%s5710_s5 + $0x6c] sm:$0xff]  }
 0x342   : > { %2290 = vmatpush1.bf16.msra.mxu0 %v4692_v23  ;;  %3983 = vmatprep.mubr.msk.bf16.mxu0 %vm662_vm8, %v2250_v19  ;;  %v2618_v19 = vld [vmem:[%s5709_s4 + $0x30] sm:$0xff]  ;;  %v3435_v23 = vand.u32 %v4663_v21, %v4950_v46 }
 0x343   : > { %2291 = vmatprep.subr.bf16.mxu0 %v4701_v2  ;;  %v4640_v2 = vld [vmem:[%s5708_s3 + $0x120] sm:$0xff]  }
 0x346   : > { %2292 = vmatpush1.bf16.msra.mxu0 %v4953_v47  ;;  %v2614_v47 = vld [vmem:[%s5709_s4 + $0x10] sm:$0xff] }
 0x347   : > { %2648 = vperm.xlu0 %4530, %v2614_v47  }
 0x349   : > { %2302 = vmatmul.mubr.bf16.vlgmr.msra.gmra.mrb[56].mxu0 %v2249_v14  ;;  %v2616_v14 = vld [vmem:[%s5709_s4 + $0x20] sm:$0xff] }
 0x34a   : > { %3984 = vmatprep.mubr.msk.bf16.mxu0 %vm662_vm8, %v2252_v41  ;;  %v2631_v41 = vld [vmem:[%s5709_s4 + $0x98] sm:$0xff] }
 0x34b   : > { %2653 = vperm.xlu0 %4530, %v2615_v5   ;;  %2733 = vperm.xlu1 %4531, %v2631_v41  }
 0x34f   : > { %2658 = vperm.xlu0 %4530, %v2616_v14   ;;  %2743 = vperm.xlu1 %4531, %v2633_v26  }
 0x351   : > { %2310 = vmatmul.mubr.bf16.gmra.mrb[60].mxu0 %v2251_v40  ;;  %v2630_v40 = vld [vmem:[%s5709_s4 + $0x90] sm:$0xff] }
 0x352   : > { %3985 = vmatprep.mubr.msk.bf16.mxu0 %vm662_vm8, %v2254_v54 }
 0x353   : > { %2668 = vperm.xlu0 %4530, %v2618_v19   ;;  %2753 = vperm.xlu1 %4531, %v2635_v29  }
 0x357   : > { %2678 = vperm.xlu0 %4530, %v2620_v16  }
 0x359   : > { %2318 = vmatmul.mubr.bf16.gmra.mrb[64].mxu0 %v2253_v53 }
 0x35a   : > { %3986 = vmatprep.mubr.msk.bf16.mxu0 %vm662_vm8, %v2256_v12  ;;  %v4653_v12 = vld [vmem:[%s5710_s5 + $0x14] ss:$0 sps:$4 sm:$0x77]   ;;  %vm4704_vm8 = vmmov 0  }
 0x35b   : > { %2688 = vperm.xlu0 %4530, %v2622_v18   ;;  %v2885_v13 = vand.u32 %v4653_v12, %v4950_v46  ;;  %4346 = vmatprep.mubr.msk.bf16.mxu1 %vm4704_vm8, %v4703_v24 }
 0x35d   : > { %4345 = vmatpush3.bf16.msra.mxu1 %v2885_v13 }
 0x35e   : > { %4350 = vmatprep.subr.bf16.mxu1 %v4703_v24 }
 0x35f   : > { %2698 = vperm.xlu0 %4530, %v2624_v27  }
 0x361   : > { %2326 = vmatmul.mubr.bf16.gmra.mrb[68].mxu0 %v2255_v11  ;;  %v4651_v11 = vld [vmem:[%s5708_s3 + $0x178] sm:$0xff]  }
 0x362   : > { %4318 = vmatprep.mubr.msk.bf16.mxu0 %vm1131_vm9, %v4640_v2 }
 0x363   : > { %2708 = vperm.xlu0 %4530, %v2626_v35  }
 0x367   : > { %2718 = vperm.xlu0 %4530, %v2628_v38  }
 0x36b   : > { %2728 = vperm.xlu0 %4530, %v2630_v40  }
 0x36f   : > { %2738 = vperm.xlu0 %4530, %v2632_v42  }
 0x373   : > { %2748 = vperm.xlu0 %4530, %v2634_v28  }
 0x39f   : > { %v2639_v47 = vpop.permute.xlu1 %2638 }
 0x3a3   : > { %v2644_v8 = vpop.permute.xlu1 %2643 }
 0x3a7   : > { %v2664_v14 = vpop.permute.xlu1 %2663 }
 0x3ab   : > { %v2674_v19 = vpop.permute.xlu1 %2673 }
 0x3af   : > { %v5497_v16 = vpop.permute.xlu1 %2683 }
 0x3b3   : > { %v2694_v42 = vpop.permute.xlu1 %2693 }
 0x3c6   : > { %v2649_v2 = vpop.permute.xlu0 %2648 }
 0x3ca   : > { %v2654_v5 = vpop.permute.xlu0 %2653 }
 0x3ce   : > { %v2659_v10 = vpop.permute.xlu0 %2658 }
 0x3d2   : > { %v2669_v15 = vpop.permute.xlu0 %2668 }
 0x3d6   : > { %v5495_v25 = vpop.permute.xlu0 %2678 }
 0x3da   : > { %v2689_v38 = vpop.permute.xlu0 %2688 }
 0x41c   : > { %v2303_v31 = vpop.f32.mrb[56].mxu0 }
 0x41d   : > { %v2305_v32 = vpop.f32.mrb[57].mxu0 }
 0x41e   : > { %v2306_v36 = vpop.f32.mrb[58].mxu0  ;;  %v4655_v32 = vld [vmem:[%s5710_s5 + $0x8] ss:$0 sps:$4 sm:$0x77]  }
 0x41f   : > { %v2359_v43 = vpack.c.bf16 %v2306_v36, %v2303_v31  ;;  %v2308_v44 = vpop.f32.mrb[59].mxu0  ;;  %v4654_v31 = vld [vmem:[%s5710_s5] sm:$0xff]  }
 0x421   : > { %4310 = vmatprep.subr.bf16.mxu0 %v2359_v43 }
 0x422   : > { %4311 = vmatpush3.bf16.msra.mxu0 %v2359_v43 }
 0x424   : > { %v2311_v45 = vpop.f32.mrb[60].mxu0 }
 0x425   : > { %v2313_v48 = vpop.f32.mrb[61].mxu0 }
 0x426   : > { %v2314_v49 = vpop.f32.mrb[62].mxu0 }
 0x427   : > { %v2360_v34 = vpack.c.bf16 %v2314_v49, %v2311_v45  ;;  %v2316_v50 = vpop.f32.mrb[63].mxu0 }
 0x428   : > { %v5505_v50 = vpop.permute.xlu0 %2698 }
 0x429   : > { %4312 = vmatprep.subr.bf16.mxu0 %v2360_v34 }
 0x42a   : > { %4313 = vmatpush3.bf16.msra.mxu0 %v2360_v34 }
 0x42c   : > { %v2319_v51 = vpop.f32.mrb[64].mxu0 }
 0x42d   : > { %v2321_v52 = vpop.f32.mrb[65].mxu0 }
 0x42e   : > { %v2322_v53 = vpop.f32.mrb[66].mxu0 }
 0x42f   : > { %v2361_v54 = vpack.c.bf16 %v2322_v53, %v2319_v51  ;;  %v2324_v55 = vpop.f32.mrb[67].mxu0 }
 0x431   : > { %4314 = vmatprep.subr.bf16.mxu0 %v2361_v54 }
 0x432   : > { %4315 = vmatpush3.bf16.msra.mxu0 %v2361_v54 }
 0x434   : > { %v2327_v56 = vpop.f32.mrb[68].mxu0 }
 0x435   : > { %v2329_v57 = vpop.f32.mrb[69].mxu0 }
 0x436   : > { %v2330_v58 = vpop.f32.mrb[70].mxu0  ;;  %v5511_v57 = vpop.permute.xlu1 %2703 }
 0x437   : > { %v2362_v59 = vpack.c.bf16 %v2330_v58, %v2327_v56  ;;  %v2332_v60 = vpop.f32.mrb[71].mxu0  ;;  %v2941_v56 = vand.u32 %v4655_v32, %v4950_v46 }
 0x439   : > { %4316 = vmatprep.subr.bf16.mxu0 %v2362_v59 }
 0x43a   : > { %4317 = vmatpush3.bf16.msra.mxu0 %v2362_v59 }
 0x43b   : > { %4414 = vmatprep.subr.bf16.mxu0 %v4703_v24 }
 0x43d   : > { %4319 = vmatmul.mubr.msk.bf16.vlgmr.msra.gmra.mrb[32].mxu0 %vm1131_vm9, %v4641_v61 }
 0x43e   : > { %4322 = vmatprep.mubr.msk.bf16.mxu0 %vm1131_vm9, %v4642_v62  ;;  %4415 = vmatpush3.bf16.msra.mxu0 %v4661_v20  ;;  %v2714_v20 = vpop.permute.xlu1 %2713 }
 0x43f   : > { %4416 = vmatprep.subr.bf16.mxu0 %v4703_v24 }
 0x442   : > { %4417 = vmatpush3.bf16.msra.mxu0 %v3435_v23 }
 0x443   : > { %4430 = vmatprep.subr.bf16.mxu0 %v4703_v24 }
 0x445   : > { %4323 = vmatmul.mubr.msk.bf16.gmra.mrb[36].mxu0 %vm1131_vm9, %v4643_v63 }
 0x446   : > { %4326 = vmatprep.mubr.msk.bf16.mxu0 %vm1131_vm9, %v4644_v0  ;;  %v4656_v0 = vld [vmem:[%s5710_s5 + $0x18] sm:$0xff]  }
 0x44d   : > { %4327 = vmatmul.mubr.msk.bf16.gmra.mrb[40].mxu0 %vm1131_vm9, %v4645_v1  ;;  %v4657_v1 = vld [vmem:[%s5710_s5 + $0x20] ss:$0 sps:$4 sm:$0x77]  }
 0x44e   : > { %4330 = vmatprep.mubr.msk.bf16.mxu0 %vm1131_vm9, %v4646_v3  ;;  %v2709_v3 = vpop.permute.xlu0 %2708 }
 0x455   : > { %4331 = vmatmul.mubr.msk.bf16.gmra.mrb[44].mxu0 %vm1131_vm9, %v4647_v4 }
 0x456   : > { %4334 = vmatprep.mubr.msk.bf16.mxu0 %vm1131_vm9, %v4648_v6 }
 0x45d   : > { %4335 = vmatmul.mubr.msk.bf16.gmra.mrb[48].mxu0 %vm1131_vm9, %v4649_v7 }
 0x45e   : > { %4338 = vmatprep.mubr.msk.bf16.mxu0 %vm1131_vm9, %v4650_v9 }
 0x465   : > { %4339 = vmatmul.mubr.msk.bf16.gmra.mrb[52].mxu0 %vm1131_vm9, %v4651_v11 }
 0x466   : > { %4418 = vmatprep.mubr.msk.bf16.mxu0 %vm4704_vm8, %v4703_v24 }
 0x510   : > { %v4320_v17 = vpop.f32.mrb[32].mxu0 }
 0x511   : > { %v2758_v18 = vadd.f32 %v4320_v17, %v2649_v2  ;;  %v2493_v22 = vpop.f32.mrb[33].mxu0 }
 0x512   : > { %v2756_v27 = vadd.f32 %v2639_v47, %v2493_v22  ;;  %v4321_v30 = vpop.f32.mrb[34].mxu0  ;;  %v4658_v22 = vld [vmem:[%s5710_s5 + $0x24] sm:$0xff]  }
 0x513   : > { %v2806_v33 = vmul.f32 0.01, %v2758_v18  ;;  %v2759_v35 = vadd.f32 %v4321_v30, %v2654_v5  ;;  %v2496_v37 = vpop.f32.mrb[35].mxu0  ;;  %vm2782_vm9 = vcmp.ge.f32.partialorder %v2758_v18, 0.0 }
 0x514   : > { %v2804_v39 = vmul.f32 0.01, %v2756_v27  ;;  %v2757_v40 = vadd.f32 %v2644_v8, %v2496_v37  ;;  %vm2780_vm14 = vcmp.ge.f32.partialorder %v2756_v27, 0.0  ;;  %v3001_v8 = vand.u32 %v4657_v1, %v4950_v46 }
 0x515   : > { %vm2783_vm15 = vcmp.ge.f32.partialorder %v2759_v35, 0.0  ;;  %v2807_v41 = vmul.f32 0.01, %v2759_v35  ;;  %v2830_v28 = vsel %vm2782_vm9, %v2758_v18, %v2806_v33 }
 0x516   : > { %vm2781_vm0 = vcmp.ge.f32.partialorder %v2757_v40, 0.0  ;;  %v2805_v26 = vmul.f32 0.01, %v2757_v40  ;;  %v2828_v36 = vsel %vm2780_vm14, %v2756_v27, %v2804_v39  ;;  %v2724_v27 = vpop.permute.xlu1 %2723 }
 0x517   : > { %v2831_v29 = vsel %vm2783_vm15, %v2759_v35, %v2807_v41 }
 0x518   : > { %v2853_v43 = vpack.c.bf16 %v2831_v29, %v2830_v28  ;;  %v2829_v44 = vsel %vm2781_vm0, %v2757_v40, %v2805_v26  ;;  %v4324_v45 = vpop.f32.mrb[36].mxu0 }
 0x519   : > { %v2852_v48 = vpack.c.bf16 %v2829_v44, %v2828_v36  ;;  %v2762_v49 = vadd.f32 %v4324_v45, %v2669_v15  ;;  %v2509_v34 = vpop.f32.mrb[37].mxu0 }
 0x51a   : > { %v2760_v51 = vadd.f32 %v2659_v10, %v2509_v34  ;;  %v4325_v52 = vpop.f32.mrb[38].mxu0  ;;  %4347 = vmatmul.mubr.msk.bf16.vlgmr.msra.gmra.mrb[80].mxu1 %vm2880_vm2, %v2853_v43  ;;  %v2734_v45 = vpop.permute.xlu1 %2733 }
 0x51b   : > { %v2810_v53 = vmul.f32 0.01, %v2762_v49  ;;  %v2763_v54 = vadd.f32 %v4325_v52, %v2674_v19  ;;  %v2512_v55 = vpop.f32.mrb[39].mxu0  ;;  %4351 = vmatpush3.bf16.msra.mxu1 %v4654_v31  ;;  %4354 = vmatprep.mubr.msk.bf16.mxu1 %vm4704_vm8, %v4703_v24  ;;  %vm2786_vm3 = vcmp.ge.f32.partialorder %v2762_v49, 0.0  ;;  %v2719_v19 = vpop.permute.xlu0 %2718 }
 0x51c   : > { %v2808_v58 = vmul.f32 0.01, %v2760_v51  ;;  %v2761_v59 = vadd.f32 %v2664_v14, %v2512_v55  ;;  %4352 = vmatprep.subr.bf16.mxu1 %v4703_v24  ;;  %vm2784_vm4 = vcmp.ge.f32.partialorder %v2760_v51, 0.0 }
 0x51d   : > { %vm2787_vm5 = vcmp.ge.f32.partialorder %v2763_v54, 0.0  ;;  %v2811_v60 = vmul.f32 0.01, %v2763_v54  ;;  %v5514_v62 = vsel %vm2786_vm3, %v2762_v49, %v2810_v53 }
 0x51e   : > { %vm2785_vm6 = vcmp.ge.f32.partialorder %v2761_v59, 0.0  ;;  %v2809_v61 = vmul.f32 0.01, %v2761_v59  ;;  %v2832_v4 = vsel %vm2784_vm4, %v2760_v51, %v2808_v58  ;;  %v4662_v51 = vld [vmem:[%s5710_s5 + $0x38] ss:$0 sps:$4 sm:$0x77]  }
 0x51f   : > { %v5516_v63 = vsel %vm2787_vm5, %v2763_v54, %v2811_v60  ;;  %4353 = vmatpush3.bf16.msra.mxu1 %v2941_v56  ;;  %v2729_v32 = vpop.permute.xlu0 %2728 }
 0x520   : > { %v2855_v6 = vpack.c.bf16 %v5516_v63, %v5514_v62  ;;  %v2833_v7 = vsel %vm2785_vm6, %v2761_v59, %v2809_v61  ;;  %v4328_v9 = vpop.f32.mrb[40].mxu0  ;;  %4358 = vmatprep.subr.bf16.mxu1 %v4703_v24 }
 0x521   : > { %v2854_v11 = vpack.c.bf16 %v2833_v7, %v2832_v4  ;;  %v2766_v12 = vadd.f32 %v4328_v9, %v2689_v38  ;;  %v2525_v13 = vpop.f32.mrb[41].mxu0  ;;  %v3125_v4 = vand.u32 %v4662_v51, %v4950_v46  ;;  %v2744_v7 = vpop.permute.xlu1 %2743 }
 0x522   : > { %v2764_v21 = vadd.f32 %v5495_v25, %v2525_v13  ;;  %v4329_v23 = vpop.f32.mrb[42].mxu0  ;;  %4355 = vmatmul.mubr.msk.bf16.vlgmr.msra.gmra.mrb[84].mxu1 %vm2880_vm2, %v2852_v48 }
 0x523   : > { %v2814_v2 = vmul.f32 0.01, %v2766_v12  ;;  %v2767_v47 = vadd.f32 %v4329_v23, %v2694_v42  ;;  %v2528_v5 = vpop.f32.mrb[43].mxu0  ;;  %4359 = vmatpush3.bf16.msra.mxu1 %v4656_v0  ;;  %4362 = vmatprep.mubr.msk.bf16.mxu1 %vm4704_vm8, %v4703_v24  ;;  %vm2790_vm7 = vcmp.ge.f32.partialorder %v2766_v12, 0.0  ;;  %v2739_v59 = vpop.permute.xlu0 %2738 }
 0x524   : > { %v2812_v10 = vmul.f32 0.01, %v2764_v21  ;;  %v2765_v14 = vadd.f32 %v5497_v16, %v2528_v5  ;;  %4360 = vmatprep.subr.bf16.mxu1 %v4703_v24  ;;  %vm2788_vm10 = vcmp.ge.f32.partialorder %v2764_v21, 0.0  ;;  %v4659_v16 = vld [vmem:[%s5710_s5 + $0x2c] ss:$0 sps:$4 sm:$0x77]  }
 0x525   : > { %vm2791_vm11 = vcmp.ge.f32.partialorder %v2767_v47, 0.0  ;;  %v2815_v15 = vmul.f32 0.01, %v2767_v47  ;;  %v5534_v17 = vsel %vm2790_vm7, %v2766_v12, %v2814_v2  ;;  %v3063_v31 = vand.u32 %v4659_v16, %v4950_v46  ;;  %v4665_v12 = vld [vmem:[%s5710_s5 + $0x84] sm:$0xff]  }
 0x526   : > { %vm2789_vm12 = vcmp.ge.f32.partialorder %v2765_v14, 0.0  ;;  %v2813_v25 = vmul.f32 0.01, %v2765_v14  ;;  %v5544_v30 = vsel %vm2788_vm10, %v2764_v21, %v2812_v10  ;;  %v4666_v21 = vld [vmem:[%s5710_s5 + $0x44] ss:$0 sps:$4 sm:$0x77]  }
 0x527   : > { %v5536_v18 = vsel %vm2791_vm11, %v2767_v47, %v2815_v15  ;;  %4361 = vmatpush3.bf16.msra.mxu1 %v3001_v8  ;;  %v4667_v23 = vld [vmem:[%s5710_s5 + $0x8c] ss:$0 sps:$4 sm:$0x77]   ;;  %v2749_v2 = vpop.permute.xlu0 %2748 }
 0x528   : > { %v2857_v33 = vpack.c.bf16 %v5536_v18, %v5534_v17  ;;  %v5548_v35 = vsel %vm2789_vm12, %v2765_v14, %v2813_v25  ;;  %v4332_v37 = vpop.f32.mrb[44].mxu0  ;;  %4366 = vmatprep.subr.bf16.mxu1 %v4703_v24  ;;  %v2754_v25 = vpop.permute.xlu1 %2753  ;;  %v4671_v17 = vld [vmem:[%s5710_s5 + $0x5c] ss:$0 sps:$4 sm:$0x77]  }
 0x529   : > { %v2856_v38 = vpack.c.bf16 %v5548_v35, %v5544_v30  ;;  %v2770_v39 = vadd.f32 %v4332_v37, %v2709_v3  ;;  %v2541_v40 = vpop.f32.mrb[45].mxu0  ;;  %v3311_v18 = vand.u32 %v4671_v17, %v4950_v46 }
 0x52a   : > { %v2768_v41 = vadd.f32 %v5505_v50, %v2541_v40  ;;  %v4333_v42 = vpop.f32.mrb[46].mxu0  ;;  %4363 = vmatmul.mubr.msk.bf16.vlgmr.msra.gmra.mrb[88].mxu1 %vm2880_vm2, %v2854_v11  ;;  %v4660_v50 = vld [vmem:[%s5710_s5 + $0x30] sm:$0xff]   ;;  %v3187_v40 = vand.u32 %v4666_v21, %v4950_v46 }
 0x52b   : > { %v2818_v26 = vmul.f32 0.01, %v2770_v39  ;;  %v2771_v28 = vadd.f32 %v4333_v42, %v2714_v20  ;;  %v2544_v29 = vpop.f32.mrb[47].mxu0  ;;  %4367 = vmatpush3.bf16.msra.mxu1 %v4658_v22  ;;  %4370 = vmatprep.mubr.msk.bf16.mxu1 %vm4704_vm8, %v4703_v24  ;;  %vm2794_vm1 = vcmp.ge.f32.partialorder %v2770_v39, 0.0 }
 0x52c   : > { %v2816_v36 = vmul.f32 0.01, %v2768_v41  ;;  %v2769_v43 = vadd.f32 %v5511_v57, %v2544_v29  ;;  %4368 = vmatprep.subr.bf16.mxu1 %v4703_v24  ;;  %vm2792_vm13 = vcmp.ge.f32.partialorder %v2768_v41, 0.0  ;;  %v4668_v29 = vld [vmem:[%s5710_s5 + $0x48] sm:$0xff]  }
 0x52d   : > { %vm2795_vm9 = vcmp.ge.f32.partialorder %v2771_v28, 0.0  ;;  %v2819_v44 = vmul.f32 0.01, %v2771_v28  ;;  %v5560_v49 = vsel %vm2794_vm1, %v2770_v39, %v2818_v26 }
 0x52e   : > { %vm2793_vm14 = vcmp.ge.f32.partialorder %v2769_v43, 0.0  ;;  %v2817_v48 = vmul.f32 0.01, %v2769_v43  ;;  %v5570_v52 = vsel %vm2792_vm13, %v2768_v41, %v2816_v36  ;;  %v3559_v41 = vand.u32 %v4667_v23, %v4950_v46 }
 0x52f   : > { %v5562_v34 = vsel %vm2795_vm9, %v2771_v28, %v2819_v44  ;;  %4369 = vmatpush3.bf16.msra.mxu1 %v3063_v31  ;;  %v4669_v31 = vld [vmem:[%s5710_s5 + $0x50] ss:$0 sps:$4 sm:$0x77]  }
 0x530   : > { %v2859_v53 = vpack.c.bf16 %v5562_v34, %v5560_v49  ;;  %v5574_v54 = vsel %vm2793_vm14, %v2769_v43, %v2817_v48  ;;  %v4336_v55 = vpop.f32.mrb[48].mxu0  ;;  %4374 = vmatprep.subr.bf16.mxu1 %v4703_v24  ;;  %v4670_v48 = vld [vmem:[%s5710_s5 + $0x54] sm:$0xff]   ;;  %v4676_v34 = vld [vmem:[%s5712_s7] sm:$0xff]  }
 0x531   : > { %v2858_v56 = vpack.c.bf16 %v5574_v54, %v5570_v52  ;;  %v2774_v57 = vadd.f32 %v4336_v55, %v2729_v32  ;;  %v2557_v58 = vpop.f32.mrb[49].mxu0  ;;  %v4674_v52 = vld [vmem:[%s5710_s5 + $0x78] sm:$0xff]   ;;  %v4675_v54 = vld [vmem:[%s5710_s5 + $0x80] ss:$0 sps:$4 sm:$0x77]  }
 0x532   : > { %v2772_v60 = vadd.f32 %v2719_v19, %v2557_v58  ;;  %v4337_v61 = vpop.f32.mrb[50].mxu0  ;;  %4371 = vmatmul.mubr.msk.bf16.vlgmr.msra.gmra.mrb[92].mxu1 %vm2880_vm2, %v2855_v6  ;;  %v4664_v6 = vld [vmem:[%s5710_s5 + $0x3c] sm:$0xff]   ;;  %v3497_v49 = vand.u32 %v4675_v54, %v4950_v46 }
 0x533   : > { %v2822_v0 = vmul.f32 0.01, %v2774_v57  ;;  %v2775_v1 = vadd.f32 %v4337_v61, %v2734_v45  ;;  %v2560_v3 = vpop.f32.mrb[51].mxu0  ;;  %4375 = vmatpush3.bf16.msra.mxu1 %v4660_v50  ;;  %4378 = vmatprep.mubr.msk.bf16.mxu1 %vm4704_vm8, %v4703_v24  ;;  %vm2798_vm15 = vcmp.ge.f32.partialorder %v2774_v57, 0.0  ;;  %v3249_v45 = vand.u32 %v4669_v31, %v4950_v46 }
 0x534   : > { %v2820_v9 = vmul.f32 0.01, %v2772_v60  ;;  %v2773_v11 = vadd.f32 %v2724_v27, %v2560_v3  ;;  %4376 = vmatprep.subr.bf16.mxu1 %v4703_v24  ;;  %vm2796_vm0 = vcmp.ge.f32.partialorder %v2772_v60, 0.0  ;;  %v4673_v50 = vld [vmem:[%s5710_s5 + $0x68] ss:$0 sps:$4 sm:$0x77]  }
 0x535   : > { %vm2799_vm3 = vcmp.ge.f32.partialorder %v2775_v1, 0.0  ;;  %v2823_v62 = vmul.f32 0.01, %v2775_v1  ;;  %v2846_v13 = vsel %vm2798_vm15, %v2774_v57, %v2822_v0  ;;  %v3373_v51 = vand.u32 %v4673_v50, %v4950_v46  ;;  %v4677_v46 = vld [vmem:[%s5712_s7 + $0x8] sm:$0xff]  }
 0x536   : > { %vm2797_vm4 = vcmp.ge.f32.partialorder %v2773_v11, 0.0  ;;  %v2821_v63 = vmul.f32 0.01, %v2773_v11  ;;  %v5599_v47 = vsel %vm2796_vm0, %v2772_v60, %v2820_v9 }
 0x537   : > { %v2847_v20 = vsel %vm2799_vm3, %v2775_v1, %v2823_v62  ;;  %4377 = vmatpush3.bf16.msra.mxu1 %v3125_v4 }
 0x538   : > { %v2861_v5 = vpack.c.bf16 %v2847_v20, %v2846_v13  ;;  %v5601_v8 = vsel %vm2797_vm4, %v2773_v11, %v2821_v63  ;;  %v4340_v10 = vpop.f32.mrb[52].mxu0  ;;  %4382 = vmatprep.subr.bf16.mxu1 %v4703_v24 }
 0x539   : > { %v2860_v14 = vpack.c.bf16 %v5601_v8, %v5599_v47  ;;  %v2778_v15 = vadd.f32 %v4340_v10, %v2749_v2  ;;  %v2573_v19 = vpop.f32.mrb[53].mxu0 }
 0x53a   : > { %v2776_v22 = vadd.f32 %v2739_v59, %v2573_v19  ;;  %v4341_v16 = vpop.f32.mrb[54].mxu0  ;;  %4379 = vmatmul.mubr.msk.bf16.vlgmr.msra.gmra.mrb[96].mxu1 %vm2880_vm2, %v2856_v38  ;;  %4419 = vmatmul.mubr.msk.bf16.vlgmr.msra.gmra.mrb[72].mxu0 %vm2880_vm2, %v2861_v5 }
 0x53b   : > { %v2826_v27 = vmul.f32 0.01, %v2778_v15  ;;  %v2779_v37 = vadd.f32 %v4341_v16, %v2754_v25  ;;  %v2576_v39 = vpop.f32.mrb[55].mxu0  ;;  %4383 = vmatpush3.bf16.msra.mxu1 %v4664_v6  ;;  %4431 = vmatpush3.bf16.msra.mxu0 %v4665_v12  ;;  %vm2802_vm5 = vcmp.ge.f32.partialorder %v2778_v15, 0.0 }
 0x53c   : > { %v2824_v42 = vmul.f32 0.01, %v2776_v22  ;;  %v2777_v26 = vadd.f32 %v2744_v7, %v2576_v39  ;;  %4384 = vmatprep.subr.bf16.mxu1 %v4703_v24  ;;  %4432 = vmatprep.subr.bf16.mxu0 %v4703_v24  ;;  %vm2800_vm6 = vcmp.ge.f32.partialorder %v2776_v22, 0.0 }
 0x53d   : > { %vm2803_vm7 = vcmp.ge.f32.partialorder %v2779_v37, 0.0  ;;  %v2827_v30 = vmul.f32 0.01, %v2779_v37  ;;  %4386 = vmatprep.mubr.msk.bf16.mxu1 %vm4704_vm8, %v4703_v24  ;;  %4434 = vmatprep.mubr.msk.bf16.mxu0 %vm4704_vm8, %v4703_v24  ;;  %v2850_v38 = vsel %vm2802_vm5, %v2778_v15, %v2826_v27 }
 0x53e   : > { %vm2801_vm10 = vcmp.ge.f32.partialorder %v2777_v26, 0.0  ;;  %v2825_v35 = vmul.f32 0.01, %v2777_v26  ;;  %v2848_v32 = vsel %vm2800_vm6, %v2776_v22, %v2824_v42 }
 0x53f   : > { %v2851_v28 = vsel %vm2803_vm7, %v2779_v37, %v2827_v30  ;;  %4385 = vmatpush3.bf16.msra.mxu1 %v3187_v40  ;;  %4433 = vmatpush3.bf16.msra.mxu0 %v3559_v41 }
 0x540   : > { %v2863_v36 = vpack.c.bf16 %v2851_v28, %v2850_v38  ;;  %v2849_v43 = vsel %vm2801_vm10, %v2777_v26, %v2825_v35  ;;  %4390 = vmatprep.subr.bf16.mxu1 %v4703_v24 }
 0x541   : > { %v2862_v44 = vpack.c.bf16 %v2849_v43, %v2848_v32 }
 0x542   : > { %4387 = vmatmul.mubr.msk.bf16.vlgmr.msra.gmra.mrb[100].mxu1 %vm2880_vm2, %v2857_v33  ;;  %4435 = vmatmul.mubr.msk.bf16.vlgmr.msra.gmra.mrb[76].mxu0 %vm2880_vm2, %v2863_v36  ;;  %v4672_v33 = vld [vmem:[%s5710_s5 + $0x60] sm:$0xff]  }
 0x543   : > { %4391 = vmatpush3.bf16.msra.mxu1 %v4668_v29  ;;  %4394 = vmatprep.mubr.msk.bf16.mxu1 %vm4704_vm8, %v4703_v24 }
 0x544   : > { %4392 = vmatprep.subr.bf16.mxu1 %v4703_v24 }
 0x547   : > { %4393 = vmatpush3.bf16.msra.mxu1 %v3249_v45 }
 0x548   : > { %4398 = vmatprep.subr.bf16.mxu1 %v4703_v24 }
 0x54a   : > { %4395 = vmatmul.mubr.msk.bf16.vlgmr.msra.gmra.mrb[104].mxu1 %vm2880_vm2, %v2858_v56 }
 0x54b   : > { %4399 = vmatpush3.bf16.msra.mxu1 %v4670_v48  ;;  %4402 = vmatprep.mubr.msk.bf16.mxu1 %vm4704_vm8, %v4703_v24 }
 0x54c   : > { %4400 = vmatprep.subr.bf16.mxu1 %v4703_v24 }
 0x54f   : > { %4401 = vmatpush3.bf16.msra.mxu1 %v3311_v18 }
 0x550   : > { %4406 = vmatprep.subr.bf16.mxu1 %v4703_v24 }
 0x552   : > { %4403 = vmatmul.mubr.msk.bf16.vlgmr.msra.gmra.mrb[108].mxu1 %vm2880_vm2, %v2859_v53 }
 0x553   : > { %4407 = vmatpush3.bf16.msra.mxu1 %v4672_v33  ;;  %4410 = vmatprep.mubr.msk.bf16.mxu1 %vm4704_vm8, %v4703_v24 }
 0x554   : > { %4408 = vmatprep.subr.bf16.mxu1 %v4703_v24 }
 0x557   : > { %4409 = vmatpush3.bf16.msra.mxu1 %v3373_v51 }
 0x558   : > { %4422 = vmatprep.subr.bf16.mxu1 %v4703_v24 }
 0x55a   : > { %4411 = vmatmul.mubr.msk.bf16.vlgmr.msra.gmra.mrb[112].mxu1 %vm2880_vm2, %v2860_v14 }
 0x55b   : > { %4423 = vmatpush3.bf16.msra.mxu1 %v4674_v52  ;;  %4426 = vmatprep.mubr.msk.bf16.mxu1 %vm4704_vm8, %v4703_v24 }
 0x55c   : > { %4424 = vmatprep.subr.bf16.mxu1 %v4703_v24 }
 0x55f   : > { %4425 = vmatpush3.bf16.msra.mxu1 %v3497_v49 }
 0x560   : > { %4438 = vmatprep.subr.bf16.mxu1 %v4703_v24 }
 0x562   : > { %4427 = vmatmul.mubr.msk.bf16.vlgmr.msra.gmra.mrb[116].mxu1 %vm2880_vm2, %v2862_v44  ;;  %vm3684_vm2 = vcmask 15360  }
 0x563   : > { %4442 = vmatprep.mubr.msk.bf16.mxu1 %vm4704_vm8, %v4703_v24  ;;  %4439 = vmatpush3.bf16.msra.mxu1 %v4676_v34  ;;  %vm3639_vm8 = vcmask 261120  }
 0x564   : > { %4440 = vmatprep.subr.bf16.mxu1 %v4703_v24 }
 0x567   : > { %4441 = vmatpush3.bf16.msra.mxu1 %v4677_v46 }
 0x5ed   : > { %v2921_v53 = vpop.f32.mrb[80].mxu1 }
 0x5ee   : > { %v4348_v55 = vpop.f32.mrb[81].mxu1 }
 0x5ef   : > { %v2924_v56 = vpop.f32.mrb[82].mxu1  ;;  %v4104_v55 = vld [vmem:[%s5711_s6] ss:$0 sm:$0xff] }
 0x5f0   : > { %v4349_v57 = vpop.f32.mrb[83].mxu1 }
 0x5f5   : > { %v2977_v58 = vpop.f32.mrb[84].mxu1 }
 0x5f6   : > { %v2978_v59 = vadd.f32 %v2977_v58, %v2921_v53  ;;  %v4356_v60 = vpop.f32.mrb[85].mxu1 }
 0x5f7   : > { %v2980_v61 = vpop.f32.mrb[86].mxu1 }
 0x5f8   : > { %v2981_v0 = vadd.f32 %v2980_v61, %v2924_v56  ;;  %v4357_v1 = vpop.f32.mrb[87].mxu1 }
 0x5fd   : > { %v3037_v3 = vpop.f32.mrb[88].mxu1 }
 0x5fe   : > { %v3044_v4 = vadd.f32 %v3037_v3, %v2978_v59  ;;  %v4364_v7 = vpop.f32.mrb[89].mxu1 }
 0x5ff   : > { %v3040_v9 = vpop.f32.mrb[90].mxu1  ;;  %v4105_v7 = vld [vmem:[%s5713_s8] ss:$0 sm:$0xff] }
 0x600   : > { %v3045_v24 = vadd.f32 %v3040_v9, %v2981_v0  ;;  %v4365_v11 = vpop.f32.mrb[91].mxu1 }
 0x605   : > { %v3099_v62 = vpop.f32.mrb[92].mxu1 }
 0x606   : > { %v3106_v63 = vadd.f32 %v3099_v62, %v3044_v4  ;;  %v4372_v6 = vpop.f32.mrb[93].mxu1 }
 0x607   : > { %v3102_v12 = vpop.f32.mrb[94].mxu1 }
 0x608   : > { %v3107_v13 = vadd.f32 %v3102_v12, %v3045_v24  ;;  %v4373_v20 = vpop.f32.mrb[95].mxu1 }
 0x60d   : > { %v3161_v21 = vpop.f32.mrb[96].mxu1  ;;  %v3471_v23 = vpop.f32.mrb[72].mxu0 }
 0x60e   : > { %v3168_v2 = vadd.f32 %v3161_v21, %v3106_v63  ;;  %v4380_v47 = vpop.f32.mrb[97].mxu1  ;;  %v4420_v5 = vpop.f32.mrb[73].mxu0 }
 0x60f   : > { %v3164_v8 = vpop.f32.mrb[98].mxu1  ;;  %v3474_v10 = vpop.f32.mrb[74].mxu0 }
 0x610   : > { %v3169_v14 = vadd.f32 %v3164_v8, %v3107_v13  ;;  %v4381_v15 = vpop.f32.mrb[99].mxu1  ;;  %v4421_v19 = vpop.f32.mrb[75].mxu0 }
 0x615   : > { %v3223_v25 = vpop.f32.mrb[100].mxu1  ;;  %v3595_v22 = vpop.f32.mrb[76].mxu0 }
 0x616   : > { %v3230_v16 = vadd.f32 %v3223_v25, %v3168_v2  ;;  %v4388_v27 = vpop.f32.mrb[101].mxu1  ;;  %v4436_v37 = vpop.f32.mrb[77].mxu0 }
 0x617   : > { %v3226_v39 = vpop.f32.mrb[102].mxu1  ;;  %v3598_v40 = vpop.f32.mrb[78].mxu0 }
 0x618   : > { %v3231_v41 = vadd.f32 %v3226_v39, %v3169_v14  ;;  %v4389_v42 = vpop.f32.mrb[103].mxu1  ;;  %v4437_v26 = vpop.f32.mrb[79].mxu0 }
 0x61d   : > { %v3285_v30 = vpop.f32.mrb[104].mxu1 }
 0x61e   : > { %v3292_v35 = vadd.f32 %v3285_v30, %v3230_v16  ;;  %v4396_v38 = vpop.f32.mrb[105].mxu1 }
 0x61f   : > { %v3288_v28 = vpop.f32.mrb[106].mxu1 }
 0x620   : > { %v3293_v29 = vadd.f32 %v3288_v28, %v3231_v41  ;;  %v4397_v31 = vpop.f32.mrb[107].mxu1 }
 0x625   : > { %v3347_v32 = vpop.f32.mrb[108].mxu1 }
 0x626   : > { %v3354_v36 = vadd.f32 %v3347_v32, %v3292_v35  ;;  %v4404_v43 = vpop.f32.mrb[109].mxu1 }
 0x627   : > { %v3350_v44 = vpop.f32.mrb[110].mxu1 }
 0x628   : > { %v3355_v45 = vadd.f32 %v3350_v44, %v3293_v29  ;;  %v4405_v48 = vpop.f32.mrb[111].mxu1 }
 0x62d   : > { %v3409_v17 = vpop.f32.mrb[112].mxu1 }
 0x62e   : > { %v3416_v18 = vadd.f32 %v3409_v17, %v3354_v36  ;;  %v4412_v33 = vpop.f32.mrb[113].mxu1 }
 0x62f   : > { %v3412_v50 = vpop.f32.mrb[114].mxu1 }
 0x630   : > { %v3417_v51 = vadd.f32 %v3412_v50, %v3355_v45  ;;  %v4413_v52 = vpop.f32.mrb[115].mxu1  ;;  %v3478_v54 = vadd.f32 %v3471_v23, %v3416_v18 }
 0x632   : > { %v3479_v49 = vadd.f32 %v3474_v10, %v3417_v51 }
 0x635   : > { %v3533_v34 = vpop.f32.mrb[116].mxu1 }
 0x636   : > { %v3540_v46 = vadd.f32 %v3533_v34, %v3478_v54  ;;  %v4428_v53 = vpop.f32.mrb[117].mxu1 }
 0x637   : > { %v3536_v56 = vpop.f32.mrb[118].mxu1 }
 0x638   : > { %v3602_v57 = vadd.f32 %v3595_v22, %v3540_v46  ;;  %v3541_v58 = vadd.f32 %v3536_v56, %v3479_v49  ;;  %v4429_v59 = vpop.f32.mrb[119].mxu1 }
 0x63a   : > { %v3611_v60 = vadd.f32 %v4104_v55, %v3602_v57  ;;  %v3603_v61 = vadd.f32 %v3598_v40, %v3541_v58 }
 0x63c   : > { %v3612_v0 = vadd.f32 %v4104_v55, %v3603_v61  ;;  %v3613_v1 = vmax.f32 %v3611_v60, 0.0 }
 0x63e   : > { %v3614_v3 = vmax.f32 %v3612_v0, 0.0 }
 0x640   : > { %v3615_v4 = vpack.c.bf16 %v3614_v3, %v3613_v1 }
 0x642   : > { %4443 = vmatmul.mubr.msk.bf16.vlgmr.msra.gmra.mrb[120].mxu1 %vm3639_vm8, %v3615_v4 }
 0x715   : > { %v3677_v9 = vpop.f32.mrb[120].mxu1 }
 0x716   : > { %v3678_v24 = vadd.f32 %v4105_v7, %v3677_v9  ;;  %v4444_v11 = vpop.f32.mrb[121].mxu1 }
 0x717   : > { %v3680_v62 = vpop.f32.mrb[122].mxu1 }
 0x718   : > { %3685 = vst.msk [vmem:[%s334_s21] sm:$0xff] %vm3684_vm2, %v3678_v24  ;;  %v3681_v63 = vadd.f32 %v4105_v7, %v3680_v62  ;;  %v4445_v6 = vpop.f32.mrb[123].mxu1 }
 0x71a   : > { %3686 = vst.msk [vmem:[%s334_s21 + $0x8] sm:$0xff] %vm3684_vm2, %v3681_v63 }
 0x71b PF: > { %s19_s30 = sadd.s32 1, %s4699_s30  }
 0x71c   : > { %p16_p5 = scmp.ge.s32.totalorder %s19_s30, 4  }
 0x71e   :  { %18 = sbr.rel (!%p16_p5) target bundleno = 1 (0x1), region = 103 }

</bundles_post_ra>
